<compile_context>
chip_gen: v5e
topology: v5e:2x2
jax: 0.10.0
libtpu: 0.0.40
codegen_flags: <defaults>
</compile_context>

<pallas_src>
import functools

import jax
import jax.numpy as jnp
from jax.experimental import pallas as pl
from jax.experimental.pallas import tpu as pltpu

HIDDEN = 1024


def _round_up(x, m):
    return ((x + m - 1) // m) * m


def _bf16_hidden_default():
    """bf16 elementwise pass for the hidden activation only where the VALU
    supports bf16 natively (v6e / v7x); f32 on v5e and older."""
    try:
        kind = jax.devices()[0].device_kind.lower()
    except Exception:
        return True
    return not any(v in kind for v in ("v2", "v3", "v4", "v5"))


# ----------------------------------------------------------------------------
# Kernel: both linear layers + activations fused; weights VMEM-resident.
# MXU operands are bf16 with f32 accumulation (preferred_element_type).
# ----------------------------------------------------------------------------
def generator_kernel(x_ref, w1_ref, b1_ref, w2_ref, b2_ref, o_ref, *, bf16_hidden):
    # fc1: bf16 x bf16 -> f32 accumulate on the MXU.
    h = jnp.dot(x_ref[...], w1_ref[...], preferred_element_type=jnp.float32)

    if bf16_hidden:
        # v6e/v7x: bias add + leaky_relu in bf16 — halves the vreg/vst traffic
        # of the (tb, 1024) hidden pass; the second dot consumes bf16 anyway.
        h = h.astype(jnp.bfloat16) + b1_ref[...]          # b1 is bf16
        h = jnp.maximum(h, h * 0.2)                       # leaky_relu(0.2)
    else:
        # v5e and older (no bf16 VALU): keep the elementwise pass in f32.
        h = h + b1_ref[...]                               # b1 is f32
        h = jnp.maximum(h, h * 0.2)
        h = h.astype(jnp.bfloat16)

    # fc2 on the MXU, then bias + tanh in f32 (tanh on the EUP).
    y = jnp.dot(h, w2_ref[...], preferred_element_type=jnp.float32)
    y = y + b2_ref[...]
    o_ref[...] = jnp.tanh(y).astype(o_ref.dtype)


# ----------------------------------------------------------------------------
# One-time parameter prep (hoisted out of the per-call path).
# ----------------------------------------------------------------------------
def prepare_generator_params(w1, b1, w2, b2, *, bf16_hidden=None):
    """Convert f32 master weights into kernel operand layout once.

    w1: (d_in, 1024), b1: (1024,) or (1, 1024),
    w2: (1024, d_out), b2: (d_out,) or (1, d_out).
    Returns a dict of device arrays to reuse across forward calls.
    """
    if bf16_hidden is None:
        bf16_hidden = _bf16_hidden_default()
    d_in, hidden = w1.shape
    d_out = w2.shape[1]
    d_out_p = _round_up(d_out, 128)  # lane-dense output block -> unmasked vst

    w1_b = w1.astype(jnp.bfloat16)
    b1_k = b1.reshape(1, hidden).astype(
        jnp.bfloat16 if bf16_hidden else jnp.float32)
    w2_b = jnp.pad(w2.astype(jnp.bfloat16), ((0, 0), (0, d_out_p - d_out)))
    b2_f = jnp.pad(b2.reshape(1, d_out).astype(jnp.float32),
                   ((0, 0), (0, d_out_p - d_out)))
    return dict(w1=w1_b, b1=b1_k, w2=w2_b, b2=b2_f,
                d_out=d_out, bf16_hidden=bf16_hidden)


# ----------------------------------------------------------------------------
# Per-call forward: only touches x.
# ----------------------------------------------------------------------------
def generator_forward(x, params, *, block_b=512):
    """x: (B, d_in) f32 -> (B, d_out) f32."""
    w1, b1, w2, b2 = params["w1"], params["b1"], params["w2"], params["b2"]
    d_out = params["d_out"]
    bf16_hidden = params["bf16_hidden"]

    B, d_in = x.shape
    hidden = w1.shape[1]
    d_out_p = w2.shape[1]

    # Batch tile: multiple of 16 (bf16 sublane packing); >=2 grid steps when B
    # allows so v7x's second TensorCore gets work; capped at block_b (sweep
    # upward for very large B — per-tile VMEM is only a few MiB).
    if B <= 16:
        tb = 16
    else:
        tb = min(block_b, _round_up(pl.cdiv(B, 2), 16))
    b_p = _round_up(B, tb)

    x_b = x.astype(jnp.bfloat16)
    if b_p != B:
        x_b = jnp.pad(x_b, ((0, b_p - B), (0, 0)))

    cost = pl.CostEstimate(
        flops=2 * b_p * (d_in * hidden + hidden * d_out_p),
        transcendentals=b_p * d_out_p,
        bytes_accessed=(x_b.size * 2 + w1.size * 2 + w2.size * 2
                        + b1.size * b1.dtype.itemsize + b2.size * 4
                        + b_p * d_out_p * 4),
    )

    kernel = functools.partial(generator_kernel, bf16_hidden=bf16_hidden)
    out = pl.pallas_call(
        kernel,
        out_shape=jax.ShapeDtypeStruct((b_p, d_out_p), jnp.float32),
        grid_spec=pltpu.PrefetchScalarGridSpec(
            num_scalar_prefetch=0,
            grid=(b_p // tb,),
            in_specs=[
                # x: tiled over batch; full (unpadded) d_in block.
                pl.BlockSpec((tb, d_in), lambda i: (i, 0)),
                # Weights / biases: constant index_map -> DMA'd once,
                # VMEM-resident across the whole grid.
                pl.BlockSpec((d_in, hidden), lambda i: (0, 0)),
                pl.BlockSpec((1, hidden), lambda i: (0, 0)),
                pl.BlockSpec((hidden, d_out_p), lambda i: (0, 0)),
                pl.BlockSpec((1, d_out_p), lambda i: (0, 0)),
            ],
            out_specs=pl.BlockSpec((tb, d_out_p), lambda i: (i, 0)),
        ),
        compiler_params=pltpu.CompilerParams(
            dimension_semantics=("parallel",)),
        cost_estimate=cost,
    )(x_b, w1, b1, w2, b2)
    return out[:B, :d_out]


# ----------------------------------------------------------------------------
# Deterministic parameter initialization (matches nn.Linear's uniform scheme,
# synthetic — no checkpoint loading).  Master copies kept in f32.
# ----------------------------------------------------------------------------
def init_generator_params(key, g_input_dim, g_output_dim, hidden=HIDDEN):
    k1, k2, k3, k4 = jax.random.split(key, 4)
    bound1 = 1.0 / jnp.sqrt(g_input_dim)
    bound2 = 1.0 / jnp.sqrt(hidden)
    # Stored as (in, out): transpose of PyTorch's (out, in) weight layout.
    w1 = jax.random.uniform(k1, (g_input_dim, hidden), jnp.float32, -bound1, bound1)
    b1 = jax.random.uniform(k2, (1, hidden), jnp.float32, -bound1, bound1)
    w2 = jax.random.uniform(k3, (hidden, g_output_dim), jnp.float32, -bound2, bound2)
    b2 = jax.random.uniform(k4, (1, g_output_dim), jnp.float32, -bound2, bound2)
    return w1, b1, w2, b2


def reference_forward(x, w1, b1, w2, b2, *, bf16_hidden):
    """Pure-JAX reference mirroring the kernel's bf16 operand quantization."""
    hi = jax.lax.Precision.HIGHEST
    xb = x.astype(jnp.bfloat16).astype(jnp.float32)
    w1f = w1.astype(jnp.bfloat16).astype(jnp.float32)
    w2f = w2.astype(jnp.bfloat16).astype(jnp.float32)
    h = jnp.dot(xb, w1f, precision=hi)
    if bf16_hidden:
        hb16 = h.astype(jnp.bfloat16) + b1.reshape(1, -1).astype(jnp.bfloat16)
        hb16 = jnp.maximum(hb16, hb16 * 0.2)
        hb = hb16.astype(jnp.float32)
    else:
        h = h + b1.reshape(1, -1)
        h = jnp.maximum(h, 0.2 * h)
        hb = h.astype(jnp.bfloat16).astype(jnp.float32)
    y = jnp.dot(hb, w2f, precision=hi) + b2.reshape(1, -1)
    return jnp.tanh(y)


if __name__ == "__main__":
    key = jax.random.PRNGKey(0)
    k_param, k_x = jax.random.split(key)

    batch = 8
    g_input_dim = 64       # latent z dim
    g_output_dim = 256     # generated sample dim

    w1, b1, w2, b2 = init_generator_params(k_param, g_input_dim, g_output_dim)
    x = jax.random.normal(k_x, (batch, g_input_dim), jnp.float32)

    # One-time weight prep (hoisted out of the per-call path).
    params = prepare_generator_params(w1, b1, w2, b2)
    for v in params.values():
        if isinstance(v, jnp.ndarray):
            jax.block_until_ready(v)

    out = generator_forward(x, params)
    out = jax.block_until_ready(out)

    ref = reference_forward(x, w1, b1, w2, b2,
                            bf16_hidden=params["bf16_hidden"])
    assert out.shape == (batch, g_output_dim)
    assert out.dtype == jnp.float32
    assert jnp.allclose(out, ref, atol=2e-3, rtol=2e-3)

    print("KERNEL_OK")
</pallas_src>

<mosaic_0001>
module attributes {stable_mosaic.version = 11 : i64} {
  func.func @generator_kernel(%arg0: i32, %arg1: memref<16x64xbf16, #tpu.memory_space<vmem>>, %arg2: memref<64x1024xbf16, #tpu.memory_space<vmem>>, %arg3: memref<1x1024xbf16, #tpu.memory_space<vmem>>, %arg4: memref<1024x256xbf16, #tpu.memory_space<vmem>>, %arg5: memref<1x256xf32, #tpu.memory_space<vmem>>, %arg6: memref<16x256xf32, #tpu.memory_space<vmem>>) attributes {dimension_semantics = [#tpu.dimension_semantics<parallel>], iteration_bounds = array<i64: 1>, scalar_prefetch = 0 : i64, scratch_operands = 0 : i64, tpu.core_type = #tpu.core_type<tc>, window_params = [{transform_indices = @transform_0, window_bounds = array<i64: 16, 64>}, {pipeline_mode = #tpu.pipeline_mode<synchronous>, transform_indices = @transform_1, window_bounds = array<i64: 64, 1024>}, {pipeline_mode = #tpu.pipeline_mode<synchronous>, transform_indices = @transform_2, window_bounds = array<i64: 1, 1024>}, {pipeline_mode = #tpu.pipeline_mode<synchronous>, transform_indices = @transform_3, window_bounds = array<i64: 1024, 256>}, {pipeline_mode = #tpu.pipeline_mode<synchronous>, transform_indices = @transform_4, window_bounds = array<i64: 1, 256>}, {transform_indices = @transform_5, window_bounds = array<i64: 16, 256>}]} {
    %c0 = arith.constant 0 : index
    %c0_0 = arith.constant 0 : index
    %0 = vector.load %arg1[%c0, %c0_0] : memref<16x64xbf16, #tpu.memory_space<vmem>>, vector<16x64xbf16>
    %c0_1 = arith.constant 0 : index
    %c0_2 = arith.constant 0 : index
    %1 = vector.load %arg2[%c0_1, %c0_2] : memref<64x1024xbf16, #tpu.memory_space<vmem>>, vector<64x1024xbf16>
    %cst = arith.constant dense<0.000000e+00> : vector<16x1024xf32>
    %2 = tpu.matmul %0, %1, %cst {dimension_numbers = #tpu.dot_dimension_numbers<[1], [0], [0], [1], [0, 0, 1, 1], [], []>} : vector<16x64xbf16>, vector<64x1024xbf16>, vector<16x1024xf32> -> vector<16x1024xf32>
    %3 = arith.truncf %2 : vector<16x1024xf32> to vector<16x1024xbf16>
    %c0_3 = arith.constant 0 : index
    %c0_4 = arith.constant 0 : index
    %4 = vector.load %arg3[%c0_3, %c0_4] : memref<1x1024xbf16, #tpu.memory_space<vmem>>, vector<1x1024xbf16>
    %5 = vector.broadcast %4 : vector<1x1024xbf16> to vector<16x1024xbf16>
    %6 = arith.addf %3, %5 : vector<16x1024xbf16>
    %cst_5 = arith.constant 2.001950e-01 : bf16
    %7 = vector.broadcast %cst_5 : bf16 to vector<16x1024xbf16>
    %8 = arith.mulf %6, %7 : vector<16x1024xbf16>
    %9 = arith.maximumf %6, %8 : vector<16x1024xbf16>
    %c0_6 = arith.constant 0 : index
    %c0_7 = arith.constant 0 : index
    %10 = vector.load %arg4[%c0_6, %c0_7] : memref<1024x256xbf16, #tpu.memory_space<vmem>>, vector<1024x256xbf16>
    %cst_8 = arith.constant dense<0.000000e+00> : vector<16x256xf32>
    %11 = tpu.matmul %9, %10, %cst_8 {dimension_numbers = #tpu.dot_dimension_numbers<[1], [0], [0], [1], [0, 0, 1, 1], [], []>} : vector<16x1024xbf16>, vector<1024x256xbf16>, vector<16x256xf32> -> vector<16x256xf32>
    %c0_9 = arith.constant 0 : index
    %c0_10 = arith.constant 0 : index
    %12 = vector.load %arg5[%c0_9, %c0_10] : memref<1x256xf32, #tpu.memory_space<vmem>>, vector<1x256xf32>
    %13 = vector.broadcast %12 : vector<1x256xf32> to vector<16x256xf32>
    %14 = arith.addf %11, %13 : vector<16x256xf32>
    %15 = math.tanh %14 : vector<16x256xf32>
    %c0_11 = arith.constant 0 : index
    %c0_12 = arith.constant 0 : index
    %16 = vector.load %arg6[%c0_11, %c0_12] : memref<16x256xf32, #tpu.memory_space<vmem>>, vector<16x256xf32>
    tpu.vector_store %arg6[%c0_11, %c0_12], %15 {strides = array<i32>} : memref<16x256xf32, #tpu.memory_space<vmem>>, vector<16x256xf32>,
    return
  }
  func.func @transform_0(%arg0: i32) -> (i32, i32) {
    %c0_i32 = arith.constant 0 : i32
    %c0_i32_0 = arith.constant 0 : i32
    return %arg0, %c0_i32 : i32, i32
  }
  func.func @transform_1(%arg0: i32) -> (i32, i32) {
    %c0_i32 = arith.constant 0 : i32
    %c0_i32_0 = arith.constant 0 : i32
    %c0_i32_1 = arith.constant 0 : i32
    return %c0_i32, %c0_i32_0 : i32, i32
  }
  func.func @transform_2(%arg0: i32) -> (i32, i32) {
    %c0_i32 = arith.constant 0 : i32
    %c0_i32_0 = arith.constant 0 : i32
    %c0_i32_1 = arith.constant 0 : i32
    return %c0_i32, %c0_i32_0 : i32, i32
  }
  func.func @transform_3(%arg0: i32) -> (i32, i32) {
    %c0_i32 = arith.constant 0 : i32
    %c0_i32_0 = arith.constant 0 : i32
    %c0_i32_1 = arith.constant 0 : i32
    return %c0_i32, %c0_i32_0 : i32, i32
  }
  func.func @transform_4(%arg0: i32) -> (i32, i32) {
    %c0_i32 = arith.constant 0 : i32
    %c0_i32_0 = arith.constant 0 : i32
    %c0_i32_1 = arith.constant 0 : i32
    return %c0_i32, %c0_i32_0 : i32, i32
  }
  func.func @transform_5(%arg0: i32) -> (i32, i32) {
    %c0_i32 = arith.constant 0 : i32
    %c0_i32_0 = arith.constant 0 : i32
    return %arg0, %c0_i32 : i32, i32
  }
}

</mosaic_0001>

<bundles_post_ra>
// kernel: tpu_custom_call.1
= control target key start
LH: loop header
LB: loop body
LE: loop exit
PB: predicated region body
PF: predicated region fallthrough
CT: control target
= control target key end

     0   :  { %10 = vsyncpa [#allocation3], 0  ;;  %s2756_s0 = inlined_call_operand.hbm [shape: bf16[16,64], index: 0, kind: input, shape index: {}]   ;;  %s2757_s1 = inlined_call_operand.hbm [shape: bf16[64,1024], index: 1, kind: input, shape index: {}]   ;;  %s2758_s2 = inlined_call_operand.hbm [shape: bf16[1,1024], index: 2, kind: input, shape index: {}]   ;;  %s2759_s3 = inlined_call_operand.hbm [shape: bf16[1024,256], index: 3, kind: input, shape index: {}]   ;;  %s2760_s4 = inlined_call_operand.vmem [shape: f32[1,256], index: 4, kind: input, shape index: {}]   ;;  %s2761_s5 = inlined_call_operand.hbm [shape: f32[16,256], index: 5, kind: output, shape index: {}]  }
   0x1   :  { %11 = vsyncpa [#allocation6], 0 }
   0x2   :  { %12 = vsyncpa [#allocation9], 0  ;;  %s31_s20 = sshll.u32 %s2757_s1, 4  ;;  %s32_s20 = int_to_ptr.hbm [resolvable:$true] %s31_s20 }
   0x3   :  { %13 = vsyncpa [#allocation4], 0  ;;  %s2558_s21 = smov [#allocation5]   ;;  %s18_s25 = sshll.u32 %s2756_s0, 4  ;;  %s19_s25 = int_to_ptr.hbm [resolvable:$true] %s18_s25 }
   0x4   :  { %s33_s22 = sshll.u32 %s2558_s21, 4  ;;  %s2559_s26 = smov 512   ;;  %s34_s22 = int_to_ptr.vmem [resolvable:$true] %s33_s22 }
   0x5   :  { %s2560_s27 = smov 32   ;;  %s2561_s28 = smov [#allocation2]  }
   0x6   :  { %39 = dma.hbm_to_vmem [thread:$0]  %s32_s20, 4096, %s34_s22, [#allocation6], %s2559_s26, %s2559_s26, %s2560_s27  }
   0x7   :  { %s20_s29 = sshll.u32 %s2561_s28, 4  ;;  %s2562_s30 = smov 64   ;;  %s21_s29 = int_to_ptr.vmem [resolvable:$true] %s20_s29 }
   0x8   :  { %s2563_s6 = smov 4   ;;  %s45_s8 = sshll.u32 %s2758_s2, 4  ;;  %s46_s8 = int_to_ptr.hbm [resolvable:$true] %s45_s8 }
   0x9   :  { %26 = dma.hbm_to_vmem [thread:$0]  %s19_s25, 128, %s21_s29, [#allocation3], %s2562_s30, %s2562_s30, %s2563_s6  }
   0xa   :  { %s2564_s9 = smov [#allocation7]   ;;  %s55_s12 = sshll.u32 %s2759_s3, 4  ;;  %s56_s12 = int_to_ptr.hbm [resolvable:$true] %s55_s12 }
   0xb   :  { %s47_s10 = sshll.u32 %s2564_s9, 4  ;;  %s2565_s13 = smov [#allocation8]   ;;  %s48_s10 = int_to_ptr.vmem [resolvable:$true] %s47_s10 }
   0xc   :  { %50 = dma.hbm_to_vmem [thread:$0]  %s46_s8, 128, %s48_s10, [#allocation6]  }
   0xd   :  { %s57_s14 = sshll.u32 %s2565_s13, 4  ;;  %s2566_s15 = smov 128   ;;  %s58_s14 = int_to_ptr.vmem [resolvable:$true] %s57_s14 }
   0xe   :  { %s2567_s16 = smov 8  }
   0xf   :  { %63 = dma.hbm_to_vmem [thread:$0]  %s56_s12, 16384, %s58_s14, [#allocation9], %s2566_s15, %s2566_s15, %s2567_s16  }
  0x10   :  { %2550 = dma.done.wait [#allocation3], 128  }
  0x11   :  { %2551 = vsyncadd [#allocation3], 4294967168 }
  0x12   :  { %2552 = dma.done.wait [#allocation6], 4224  }
  0x13   :  { %2553 = vsyncadd [#allocation6], 4294963072 }
  0x14   :  { %2554 = dma.done.wait [#allocation9], 16384  }
  0x15   :  { %2555 = vsyncadd [#allocation9], 4294950912  ;;  %v1698_v0 = vld [vmem:[#allocation5 + $0xc0] sm:$0xf]  ;;  %v2273_v2 = vld [vmem:[#allocation5 + $0xc4] sm:$0xf] }
  0x16   :  { %v2277_v1 = vld [vmem:[#allocation5 + $0xdc] sm:$0xf0]  ;;  %v1700_v4 = vld [vmem:[#allocation5 + $0xe0] sm:$0xf0]  ;;  %v1706_v5 = vld [vmem:[#allocation5 + $0xc8] sm:$0xf] }
  0x17   :  { %v1699_v3 = vor.u32 %v2277_v1, %v1698_v0  ;;  %v2278_v6 = vld [vmem:[#allocation5 + $0xe4] sm:$0xf0]  ;;  %v1703_v7 = vor.u32 %v2273_v2, %v1700_v4  ;;  %v2274_v9 = vld [vmem:[#allocation5 + $0xcc] sm:$0xf]  ;;  %v1666_v11 = vld [vmem:[#allocation5 + $0x80] sm:$0xf] }
  0x18   :  { %v1707_v8 = vor.u32 %v2278_v6, %v1706_v5  ;;  %v1708_v10 = vld [vmem:[#allocation5 + $0xe8] sm:$0xf0]  ;;  %v2269_v13 = vld [vmem:[#allocation5 + $0x9c] sm:$0xf0]  ;;  %v2265_v14 = vld [vmem:[#allocation5 + $0x84] sm:$0xf] }
  0x19   :  { %290 = vmatpush.bf16.msra.mxu0 %v1699_v3  ;;  %v1711_v12 = vor.u32 %v2274_v9, %v1708_v10  ;;  %v1668_v15 = vld [vmem:[#allocation5 + $0xa0] sm:$0xf0]  ;;  %304 = vmatpush.bf16.msra.mxu1 %v1703_v7  ;;  %v1667_v16 = vor.u32 %v2269_v13, %v1666_v11  ;;  %v1674_v18 = vld [vmem:[#allocation5 + $0x88] sm:$0xf]  ;;  %v2266_v20 = vld [vmem:[#allocation5 + $0x8c] sm:$0xf] }
  0x1a   :  { %318 = vmatpush.bf16.msra.mxu2 %v1707_v8  ;;  %v1671_v17 = vor.u32 %v2265_v14, %v1668_v15  ;;  %v2270_v19 = vld [vmem:[#allocation5 + $0xa4] sm:$0xf0]  ;;  %v1676_v22 = vld [vmem:[#allocation5 + $0xa8] sm:$0xf0]  ;;  %v1634_v23 = vld [vmem:[#allocation5 + $0x40] sm:$0xf] }
  0x1b   :  { %332 = vmatpush.bf16.msra.mxu3 %v1711_v12  ;;  %v1675_v21 = vor.u32 %v2270_v19, %v1674_v18  ;;  %v2261_v24 = vld [vmem:[#allocation5 + $0x5c] sm:$0xf0]  ;;  %v1679_v25 = vor.u32 %v2266_v20, %v1676_v22  ;;  %v2257_v26 = vld [vmem:[#allocation5 + $0x44] sm:$0xf]  ;;  %v1642_v28 = vld [vmem:[#allocation5 + $0x48] sm:$0xf] }
  0x1c   :  { %v1636_v27 = vld [vmem:[#allocation5 + $0x60] sm:$0xf0]  ;;  %v1635_v29 = vor.u32 %v2261_v24, %v1634_v23  ;;  %v2262_v30 = vld [vmem:[#allocation5 + $0x64] sm:$0xf0]  ;;  %v2258_v31 = vld [vmem:[#allocation5 + $0x4c] sm:$0xf] }
  0x1d   :  { %291 = vmatpush.bf16.msra.mxu0 %v1667_v16  ;;  %v1644_v32 = vld [vmem:[#allocation5 + $0x68] sm:$0xf0]  ;;  %305 = vmatpush.bf16.msra.mxu1 %v1671_v17  ;;  %v1639_v33 = vor.u32 %v2257_v26, %v1636_v27  ;;  %v1643_v34 = vor.u32 %v2262_v30, %v1642_v28  ;;  %v1602_v35 = vld [vmem:[#allocation5] sm:$0xf]  ;;  %v2249_v37 = vld [vmem:[#allocation5 + $0x4] sm:$0xf] }
  0x1e   :  { %319 = vmatpush.bf16.msra.mxu2 %v1675_v21  ;;  %v2253_v36 = vld [vmem:[#allocation5 + $0x1c] sm:$0xf0]  ;;  %v1647_v38 = vor.u32 %v2258_v31, %v1644_v32  ;;  %v1604_v39 = vld [vmem:[#allocation5 + $0x20] sm:$0xf0]  ;;  %v1610_v40 = vld [vmem:[#allocation5 + $0x8] sm:$0xf] }
  0x1f   :  { %333 = vmatpush.bf16.msra.mxu3 %v1679_v25  ;;  %v2254_v41 = vld [vmem:[#allocation5 + $0x24] sm:$0xf0]  ;;  %v2250_v42 = vld [vmem:[#allocation5 + $0xc] sm:$0xf]  ;;  %v1603_v44 = vor.u32 %v2253_v36, %v1602_v35  ;;  %v1714_v45 = vld [vmem:[#allocation5 + $0xd0] sm:$0xf]  ;;  %v1607_v48 = vor.u32 %v2249_v37, %v1604_v39 }
  0x20   :  { %v1612_v43 = vld [vmem:[#allocation5 + $0x28] sm:$0xf0]  ;;  %v2279_v46 = vld [vmem:[#allocation5 + $0xec] sm:$0xf0]  ;;  %v2275_v47 = vld [vmem:[#allocation5 + $0xd4] sm:$0xf]  ;;  %v1611_v49 = vor.u32 %v2254_v41, %v1610_v40 }
  0x21   :  { %292 = vmatpush.bf16.msra.mxu0 %v1635_v29  ;;  %306 = vmatpush.bf16.msra.mxu1 %v1639_v33  ;;  %v2613_v50 = vld [vmem:[#allocation2] sm:$0xff]  ;;  %v1716_v51 = vld [vmem:[#allocation5 + $0xf0] sm:$0xf0]  ;;  %v1615_v52 = vor.u32 %v2250_v42, %v1612_v43  ;;  %v1715_v53 = vor.u32 %v2279_v46, %v1714_v45  ;;  %v1682_v59 = vld [vmem:[#allocation5 + $0x90] sm:$0xf]  ;;  %vm282_vm0 = vcmask 523264  }
  0x22   :  { %320 = vmatpush.bf16.msra.mxu2 %v1643_v34  ;;  %v1722_v54 = vld [vmem:[#allocation5 + $0xd8] sm:$0xf]  ;;  %v2276_v56 = vld [vmem:[#allocation5 + $0xdc] sm:$0xf]  ;;  %v1719_v57 = vor.u32 %v2275_v47, %v1716_v51  ;;  %v2271_v60 = vld [vmem:[#allocation5 + $0xac] sm:$0xf0] }
  0x23   :  { %334 = vmatpush.bf16.msra.mxu3 %v1647_v38  ;;  %v2280_v55 = vld [vmem:[#allocation5 + $0xf4] sm:$0xf0]  ;;  %v1724_v58 = vld [vmem:[#allocation5 + $0xf8] sm:$0xf0]  ;;  %v2267_v61 = vld [vmem:[#allocation5 + $0x94] sm:$0xf]  ;;  %v1683_v1 = vor.u32 %v2271_v60, %v1682_v59 }
  0x24   :  { %v1684_v62 = vld [vmem:[#allocation5 + $0xb0] sm:$0xf0]  ;;  %v1723_v63 = vor.u32 %v2280_v55, %v1722_v54  ;;  %v1727_v0 = vor.u32 %v2276_v56, %v1724_v58  ;;  %v1690_v2 = vld [vmem:[#allocation5 + $0x98] sm:$0xf]  ;;  %v2268_v4 = vld [vmem:[#allocation5 + $0x9c] sm:$0xf] }
  0x25   :  { %293 = vmatpush.bf16.msra.mxu0 %v1603_v44  ;;  %307 = vmatpush.bf16.msra.mxu1 %v1607_v48  ;;  %v2272_v3 = vld [vmem:[#allocation5 + $0xb4] sm:$0xf0]  ;;  %v1687_v5 = vor.u32 %v2267_v61, %v1684_v62  ;;  %v1692_v6 = vld [vmem:[#allocation5 + $0xb8] sm:$0xf0]  ;;  %v1650_v7 = vld [vmem:[#allocation5 + $0x50] sm:$0xf] }
  0x26   :  { %321 = vmatpush.bf16.msra.mxu2 %v1611_v49  ;;  %v2263_v8 = vld [vmem:[#allocation5 + $0x6c] sm:$0xf0]  ;;  %v2259_v9 = vld [vmem:[#allocation5 + $0x54] sm:$0xf]  ;;  %v1691_v11 = vor.u32 %v2272_v3, %v1690_v2  ;;  %v1658_v12 = vld [vmem:[#allocation5 + $0x58] sm:$0xf]  ;;  %v1695_v13 = vor.u32 %v2268_v4, %v1692_v6 }
  0x27   :  { %335 = vmatpush.bf16.msra.mxu3 %v1615_v52  ;;  %v1652_v10 = vld [vmem:[#allocation5 + $0x70] sm:$0xf0]  ;;  %v1651_v14 = vor.u32 %v2263_v8, %v1650_v7  ;;  %v2264_v15 = vld [vmem:[#allocation5 + $0x74] sm:$0xf0]  ;;  %v2260_v16 = vld [vmem:[#allocation5 + $0x5c] sm:$0xf] }
  0x28   :  { %1728 = vmatmul.msk.bf16.vlgmr.msra.gmra.mxu0 %vm282_vm0, %v2613_v50  ;;  %1729 = vmatmul.msk.bf16.vlgmr.msra.gmra.mxu1 %vm282_vm0, %v2613_v50  ;;  %v1660_v17 = vld [vmem:[#allocation5 + $0x78] sm:$0xf0]  ;;  %v1655_v18 = vor.u32 %v2259_v9, %v1652_v10  ;;  %v1618_v19 = vld [vmem:[#allocation5 + $0x10] sm:$0xf]  ;;  %v2251_v21 = vld [vmem:[#allocation5 + $0x14] sm:$0xf]  ;;  %v1659_v25 = vor.u32 %v2264_v15, %v1658_v12 }
  0x29   :  { %346 = vmatpush.bf16.msrb.mxu0 %v1715_v53  ;;  %360 = vmatpush.bf16.msrb.mxu1 %v1719_v57  ;;  %v2255_v20 = vld [vmem:[#allocation5 + $0x2c] sm:$0xf0]  ;;  %v1620_v22 = vld [vmem:[#allocation5 + $0x30] sm:$0xf0]  ;;  %v1794_v23 = vld [vmem:[#allocation8 + $0x70] sm:$0xf]  ;;  %v1663_v28 = vor.u32 %v2260_v16, %v1660_v17 }
  0x2a   :  { %1730 = vmatmul.msk.bf16.vlgmr.msra.gmra.mxu2 %vm282_vm0, %v2613_v50  ;;  %1731 = vmatmul.msk.bf16.vlgmr.msra.gmra.mxu3 %vm282_vm0, %v2613_v50  ;;  %v2296_v24 = vld [vmem:[#allocation8 + $0x74] sm:$0xf0]  ;;  %v1858_v26 = vld [vmem:[#allocation8 + $0xf0] sm:$0xf]  ;;  %v1619_v29 = vor.u32 %v2255_v20, %v1618_v19  ;;  %v2252_v32 = vld [vmem:[#allocation5 + $0x1c] sm:$0xf]  ;;  %v1623_v33 = vor.u32 %v2251_v21, %v1620_v22 }
  0x2b   :  { %374 = vmatpush.bf16.msrb.mxu2 %v1723_v63  ;;  %388 = vmatpush.bf16.msrb.mxu3 %v1727_v0  ;;  %v2312_v27 = vld [vmem:[#allocation8 + $0xf4] sm:$0xf0]  ;;  %v1626_v30 = vld [vmem:[#allocation5 + $0x18] sm:$0xf]  ;;  %v1628_v34 = vld [vmem:[#allocation5 + $0x38] sm:$0xf0]  ;;  %v1795_v35 = vor.u32 %v2296_v24, %v1794_v23 }
  0x2c   :  { %v2256_v31 = vld [vmem:[#allocation5 + $0x34] sm:$0xf0]  ;;  %v2328_v37 = vld [vmem:[#allocation8 + $0x174] sm:$0xf0]  ;;  %v1859_v38 = vor.u32 %v2312_v27, %v1858_v26  ;;  %v1631_v42 = vor.u32 %v2252_v32, %v1628_v34  ;;  %v1786_v43 = vld [vmem:[#allocation8 + $0x60] sm:$0xf] }
  0x2d   :  { %347 = vmatpush.bf16.msrb.mxu0 %v1683_v1  ;;  %361 = vmatpush.bf16.msrb.mxu1 %v1687_v5  ;;  %v1922_v36 = vld [vmem:[#allocation8 + $0x170] sm:$0xf]  ;;  %v2344_v40 = vld [vmem:[#allocation8 + $0x1f4] sm:$0xf0]  ;;  %v1627_v41 = vor.u32 %v2256_v31, %v1626_v30  ;;  %v2294_v44 = vld [vmem:[#allocation8 + $0x64] sm:$0xf0] }
  0x2e   :  { %v1986_v39 = vld [vmem:[#allocation8 + $0x1f0] sm:$0xf]  ;;  %v1850_v45 = vld [vmem:[#allocation8 + $0xe0] sm:$0xf]  ;;  %v1923_v46 = vor.u32 %v2328_v37, %v1922_v36  ;;  %v2310_v47 = vld [vmem:[#allocation8 + $0xe4] sm:$0xf0]  ;;  %v1787_v54 = vor.u32 %v2294_v44, %v1786_v43 }
  0x2f   :  { %375 = vmatpush.bf16.msrb.mxu2 %v1691_v11  ;;  %389 = vmatpush.bf16.msrb.mxu3 %v1695_v13  ;;  %v1987_v48 = vor.u32 %v2344_v40, %v1986_v39  ;;  %v1914_v49 = vld [vmem:[#allocation8 + $0x160] sm:$0xf]  ;;  %v2326_v51 = vld [vmem:[#allocation8 + $0x164] sm:$0xf0]  ;;  %v1851_v55 = vor.u32 %v2310_v47, %v1850_v45  ;;  %v1778_v56 = vld [vmem:[#allocation8 + $0x50] sm:$0xf] }
  0x30   :  { %v1978_v52 = vld [vmem:[#allocation8 + $0x1e0] sm:$0xf]  ;;  %v2342_v53 = vld [vmem:[#allocation8 + $0x1e4] sm:$0xf0]  ;;  %v2292_v57 = vld [vmem:[#allocation8 + $0x54] sm:$0xf0]  ;;  %v1915_v59 = vor.u32 %v2326_v51, %v1914_v49 }
  0x31   :  { %348 = vmatpush.bf16.msrb.mxu0 %v1651_v14  ;;  %362 = vmatpush.bf16.msrb.mxu1 %v1655_v18  ;;  %v1842_v58 = vld [vmem:[#allocation8 + $0xd0] sm:$0xf]  ;;  %v2308_v60 = vld [vmem:[#allocation8 + $0xd4] sm:$0xf0]  ;;  %v1979_v61 = vor.u32 %v2342_v53, %v1978_v52  ;;  %v1779_v2 = vor.u32 %v2292_v57, %v1778_v56  ;;  %v1770_v4 = vld [vmem:[#allocation8 + $0x40] sm:$0xf] }
  0x32   :  { %v1906_v62 = vld [vmem:[#allocation8 + $0x150] sm:$0xf]  ;;  %v2324_v63 = vld [vmem:[#allocation8 + $0x154] sm:$0xf0]  ;;  %v1843_v3 = vor.u32 %v2308_v60, %v1842_v58  ;;  %v2290_v5 = vld [vmem:[#allocation8 + $0x44] sm:$0xf0] }
  0x33   :  { %376 = vmatpush.bf16.msrb.mxu2 %v1659_v25  ;;  %390 = vmatpush.bf16.msrb.mxu3 %v1663_v28  ;;  %v1970_v0 = vld [vmem:[#allocation8 + $0x1d0] sm:$0xf]  ;;  %v2340_v1 = vld [vmem:[#allocation8 + $0x1d4] sm:$0xf0]  ;;  %v1834_v6 = vld [vmem:[#allocation8 + $0xc0] sm:$0xf]  ;;  %v1907_v7 = vor.u32 %v2324_v63, %v1906_v62  ;;  %v1771_v14 = vor.u32 %v2290_v5, %v1770_v4 }
  0x34   :  { %v2306_v8 = vld [vmem:[#allocation8 + $0xc4] sm:$0xf0]  ;;  %v1971_v9 = vor.u32 %v2340_v1, %v1970_v0  ;;  %v1898_v10 = vld [vmem:[#allocation8 + $0x140] sm:$0xf]  ;;  %v1762_v15 = vld [vmem:[#allocation8 + $0x30] sm:$0xf] }
  0x35   :  { %349 = vmatpush.bf16.msrb.mxu0 %v1619_v29  ;;  %363 = vmatpush.bf16.msrb.mxu1 %v1623_v33  ;;  %v2322_v11 = vld [vmem:[#allocation8 + $0x144] sm:$0xf0]  ;;  %v1962_v12 = vld [vmem:[#allocation8 + $0x1c0] sm:$0xf]  ;;  %v2288_v16 = vld [vmem:[#allocation8 + $0x34] sm:$0xf0] }
  0x36   :  { %v2338_v13 = vld [vmem:[#allocation8 + $0x1c4] sm:$0xf0]  ;;  %v1826_v17 = vld [vmem:[#allocation8 + $0xb0] sm:$0xf]  ;;  %v1899_v18 = vor.u32 %v2322_v11, %v1898_v10  ;;  %v2304_v19 = vld [vmem:[#allocation8 + $0xb4] sm:$0xf0]  ;;  %v1763_v25 = vor.u32 %v2288_v16, %v1762_v15 }
  0x37   :  { %377 = vmatpush.bf16.msrb.mxu2 %v1627_v41  ;;  %391 = vmatpush.bf16.msrb.mxu3 %v1631_v42  ;;  %v1963_v20 = vor.u32 %v2338_v13, %v1962_v12  ;;  %v1890_v21 = vld [vmem:[#allocation8 + $0x130] sm:$0xf]  ;;  %v2320_v22 = vld [vmem:[#allocation8 + $0x134] sm:$0xf0]  ;;  %v1827_v26 = vor.u32 %v2304_v19, %v1826_v17  ;;  %v1754_v27 = vld [vmem:[#allocation8 + $0x20] sm:$0xf] }
  0x38   :  { %1732 = vmatmul.msk.bf16.vlgmr.msrb.gmra.mxu0 %vm282_vm0, %v2613_v50  ;;  %1733 = vmatmul.msk.bf16.vlgmr.msrb.gmra.mxu1 %vm282_vm0, %v2613_v50  ;;  %v1954_v23 = vld [vmem:[#allocation8 + $0x1b0] sm:$0xf]  ;;  %v2336_v24 = vld [vmem:[#allocation8 + $0x1b4] sm:$0xf0]  ;;  %v2286_v28 = vld [vmem:[#allocation8 + $0x24] sm:$0xf0]  ;;  %v1891_v30 = vor.u32 %v2320_v22, %v1890_v21 }
  0x39   :  { %1343 = vmatpush.bf16.msra.mxu0 %v1795_v35  ;;  %1357 = vmatpush.bf16.msra.mxu1 %v1859_v38  ;;  %v1818_v29 = vld [vmem:[#allocation8 + $0xa0] sm:$0xf]  ;;  %v2302_v31 = vld [vmem:[#allocation8 + $0xa4] sm:$0xf0]  ;;  %v1955_v32 = vor.u32 %v2336_v24, %v1954_v23  ;;  %v1755_v37 = vor.u32 %v2286_v28, %v1754_v27  ;;  %v1746_v39 = vld [vmem:[#allocation8 + $0x10] sm:$0xf] }
  0x3a   :  { %1734 = vmatmul.msk.bf16.vlgmr.msrb.gmra.mxu2 %vm282_vm0, %v2613_v50  ;;  %1735 = vmatmul.msk.bf16.vlgmr.msrb.gmra.mxu3 %vm282_vm0, %v2613_v50  ;;  %v1835_v50 = vor.u32 %v2306_v8, %v1834_v6  ;;  %v1882_v33 = vld [vmem:[#allocation8 + $0x120] sm:$0xf]  ;;  %v2318_v34 = vld [vmem:[#allocation8 + $0x124] sm:$0xf0]  ;;  %v1819_v38 = vor.u32 %v2302_v31, %v1818_v29  ;;  %v2284_v40 = vld [vmem:[#allocation8 + $0x14] sm:$0xf0] }
  0x3b   :  { %1371 = vmatpush.bf16.msra.mxu2 %v1923_v46  ;;  %1385 = vmatpush.bf16.msra.mxu3 %v1987_v48  ;;  %v1946_v35 = vld [vmem:[#allocation8 + $0x1a0] sm:$0xf]  ;;  %v2334_v36 = vld [vmem:[#allocation8 + $0x1a4] sm:$0xf0]  ;;  %v1810_v41 = vld [vmem:[#allocation8 + $0x90] sm:$0xf]  ;;  %v1883_v42 = vor.u32 %v2318_v34, %v1882_v33  ;;  %v1747_v49 = vor.u32 %v2284_v40, %v1746_v39 }
  0x3c   :  { %v2300_v43 = vld [vmem:[#allocation8 + $0x94] sm:$0xf0]  ;;  %v1947_v44 = vor.u32 %v2334_v36, %v1946_v35  ;;  %v1874_v45 = vld [vmem:[#allocation8 + $0x110] sm:$0xf]  ;;  %v1738_v52 = vld [vmem:[#allocation8] sm:$0xf] }
  0x3d   :  { %1344 = vmatpush.bf16.msra.mxu0 %v1787_v54  ;;  %1358 = vmatpush.bf16.msra.mxu1 %v1851_v55  ;;  %v2316_v46 = vld [vmem:[#allocation8 + $0x114] sm:$0xf0]  ;;  %v1938_v47 = vld [vmem:[#allocation8 + $0x190] sm:$0xf]  ;;  %v1811_v51 = vor.u32 %v2300_v43, %v1810_v41  ;;  %v2282_v53 = vld [vmem:[#allocation8 + $0x4] sm:$0xf0] }
  0x3e   :  { %v2332_v48 = vld [vmem:[#allocation8 + $0x194] sm:$0xf0]  ;;  %v1802_v54 = vld [vmem:[#allocation8 + $0x80] sm:$0xf]  ;;  %v1875_v55 = vor.u32 %v2316_v46, %v1874_v45  ;;  %v2298_v56 = vld [vmem:[#allocation8 + $0x84] sm:$0xf0]  ;;  %v1739_v62 = vor.u32 %v2282_v53, %v1738_v52 }
  0x3f   :  { %1372 = vmatpush.bf16.msra.mxu2 %v1915_v59  ;;  %1386 = vmatpush.bf16.msra.mxu3 %v1979_v61  ;;  %v2050_v57 = vld [vmem:[#allocation8 + $0x270] sm:$0xf]  ;;  %v2360_v58 = vld [vmem:[#allocation8 + $0x274] sm:$0xf0]  ;;  %v1939_v59 = vor.u32 %v2332_v48, %v1938_v47  ;;  %v1803_v63 = vor.u32 %v2298_v56, %v1802_v54  ;;  %v2358_v4 = vld [vmem:[#allocation8 + $0x264] sm:$0xf0] }
  0x40   :  { %v2114_v60 = vld [vmem:[#allocation8 + $0x2f0] sm:$0xf]  ;;  %v2376_v61 = vld [vmem:[#allocation8 + $0x2f4] sm:$0xf0]  ;;  %v2051_v0 = vor.u32 %v2360_v58, %v2050_v57  ;;  %v2106_v6 = vld [vmem:[#allocation8 + $0x2e0] sm:$0xf] }
  0x41   :  { %1345 = vmatpush.bf16.msra.mxu0 %v1779_v2  ;;  %1359 = vmatpush.bf16.msra.mxu1 %v1843_v3  ;;  %v2115_v1 = vor.u32 %v2376_v61, %v2114_v60  ;;  %v406_v2 = vld [vmem:[#allocation7] sm:$0xff]  ;;  %v2042_v3 = vld [vmem:[#allocation8 + $0x260] sm:$0xf]  ;;  %v2314_v10 = vld [vmem:[#allocation8 + $0x104] sm:$0xf0]  ;;  %s1581_s20 = sshll.u32 %s2761_s5, 4  ;;  %s1582_s20 = int_to_ptr.hbm [resolvable:$true] %s1581_s20 }
  0x42   :  { %408 = vst [vmem:[#allocation1] ss:$9 sm:$0xff] %v406_v2  ;;  %v2043_v5 = vor.u32 %v2358_v4, %v2042_v3  ;;  %v1866_v8 = vld [vmem:[#allocation8 + $0x100] sm:$0xf]  ;;  %v2330_v12 = vld [vmem:[#allocation8 + $0x184] sm:$0xf0] }
  0x43   :  { %1373 = vmatpush.bf16.msra.mxu2 %v1907_v7  ;;  %1387 = vmatpush.bf16.msra.mxu3 %v1971_v9  ;;  %v2374_v7 = vld [vmem:[#allocation8 + $0x2e4] sm:$0xf0]  ;;  %v1930_v11 = vld [vmem:[#allocation8 + $0x180] sm:$0xf]  ;;  %v1867_v13 = vor.u32 %v2314_v10, %v1866_v8  ;;  %v2392_v15 = vld [vmem:[#allocation8 + $0x374] sm:$0xf0] }
  0x44   :  { %v2107_v9 = vor.u32 %v2374_v7, %v2106_v6  ;;  %v2242_v16 = vld [vmem:[#allocation8 + $0x3f0] sm:$0xf]  ;;  %v2372_v24 = vld [vmem:[#allocation8 + $0x2d4] sm:$0xf0]  ;;  %v2390_v27 = vld [vmem:[#allocation8 + $0x364] sm:$0xf0] }
  0x45   :  { %1346 = vmatpush.bf16.msra.mxu0 %v1771_v14  ;;  %1360 = vmatpush.bf16.msra.mxu1 %v1835_v50  ;;  %v1931_v14 = vor.u32 %v2330_v12, %v1930_v11  ;;  %v2178_v50 = vld [vmem:[#allocation8 + $0x370] sm:$0xf]  ;;  %v2234_v28 = vld [vmem:[#allocation8 + $0x3e0] sm:$0xf]  ;;  %v2354_v33 = vld [vmem:[#allocation8 + $0x244] sm:$0xf0] }
  0x46   :  { %v2179_v17 = vor.u32 %v2392_v15, %v2178_v50  ;;  %v2034_v19 = vld [vmem:[#allocation8 + $0x250] sm:$0xf]  ;;  %v2026_v31 = vld [vmem:[#allocation8 + $0x240] sm:$0xf]  ;;  %v2370_v35 = vld [vmem:[#allocation8 + $0x2c4] sm:$0xf0] }
  0x47   :  { %1374 = vmatpush.bf16.msra.mxu2 %v1899_v18  ;;  %1388 = vmatpush.bf16.msra.mxu3 %v1963_v20  ;;  %v2408_v18 = vld [vmem:[#allocation8 + $0x3f4] sm:$0xf0]  ;;  %v2098_v23 = vld [vmem:[#allocation8 + $0x2d0] sm:$0xf]  ;;  %v2090_v34 = vld [vmem:[#allocation8 + $0x2c0] sm:$0xf]  ;;  %v2027_v36 = vor.u32 %v2354_v33, %v2026_v31 }
  0x48   :  { %v2356_v20 = vld [vmem:[#allocation8 + $0x254] sm:$0xf0]  ;;  %v2243_v21 = vor.u32 %v2408_v18, %v2242_v16  ;;  %v2226_v40 = vld [vmem:[#allocation8 + $0x3d0] sm:$0xf]  ;;  %v2386_v52 = vld [vmem:[#allocation8 + $0x344] sm:$0xf0] }
  0x49   :  { %1347 = vmatpush.bf16.msra.mxu0 %v1763_v25  ;;  %1361 = vmatpush.bf16.msra.mxu1 %v1827_v26  ;;  %v2035_v22 = vor.u32 %v2356_v20, %v2034_v19  ;;  %v2099_v25 = vor.u32 %v2372_v24, %v2098_v23  ;;  %v2170_v26 = vld [vmem:[#allocation8 + $0x360] sm:$0xf]  ;;  %v2388_v39 = vld [vmem:[#allocation8 + $0x354] sm:$0xf0]  ;;  %v2018_v43 = vld [vmem:[#allocation8 + $0x230] sm:$0xf] }
  0x4a   :  { %v2171_v29 = vor.u32 %v2390_v27, %v2170_v26  ;;  %v2082_v47 = vld [vmem:[#allocation8 + $0x2b0] sm:$0xf]  ;;  %v2368_v48 = vld [vmem:[#allocation8 + $0x2b4] sm:$0xf0]  ;;  %v2218_v53 = vld [vmem:[#allocation8 + $0x3c0] sm:$0xf] }
  0x4b   :  { %1375 = vmatpush.bf16.msra.mxu2 %v1891_v30  ;;  %1389 = vmatpush.bf16.msra.mxu3 %v1955_v32  ;;  %v2406_v30 = vld [vmem:[#allocation8 + $0x3e4] sm:$0xf0]  ;;  %v2010_v57 = vld [vmem:[#allocation8 + $0x220] sm:$0xf]  ;;  %v2400_v3 = vld [vmem:[#allocation8 + $0x3b4] sm:$0xf0] }
  0x4c   :  { %v2235_v32 = vor.u32 %v2406_v30, %v2234_v28  ;;  %v2350_v58 = vld [vmem:[#allocation8 + $0x224] sm:$0xf0]  ;;  %v2348_v6 = vld [vmem:[#allocation8 + $0x214] sm:$0xf0]  ;;  %v2066_v7 = vld [vmem:[#allocation8 + $0x290] sm:$0xf] }
  0x4d   :  { %1348 = vmatpush.bf16.msra.mxu0 %v1755_v37  ;;  %1362 = vmatpush.bf16.msra.mxu1 %v1819_v38  ;;  %v2162_v37 = vld [vmem:[#allocation8 + $0x350] sm:$0xf]  ;;  %v2091_v38 = vor.u32 %v2370_v35, %v2090_v34  ;;  %v2011_v60 = vor.u32 %v2350_v58, %v2010_v57  ;;  %v2366_v61 = vld [vmem:[#allocation8 + $0x2a4] sm:$0xf0]  ;;  %v2138_v11 = vld [vmem:[#allocation8 + $0x320] sm:$0xf] }
  0x4e   :  { %v2163_v41 = vor.u32 %v2388_v39, %v2162_v37  ;;  %v2382_v12 = vld [vmem:[#allocation8 + $0x324] sm:$0xf0]  ;;  %v410_v50 = vld [vmem:[#allocation1 + $0x9] sm:$0xff]  ;;  %v1994_v18 = vld [vmem:[#allocation8 + $0x200] sm:$0xf]  ;;  %s2569_s21 = smov 256  }
  0x4f   :  { %1376 = vmatpush.bf16.msra.mxu2 %v1883_v42  ;;  %1390 = vmatpush.bf16.msra.mxu3 %v1947_v44  ;;  %v2404_v42 = vld [vmem:[#allocation8 + $0x3d4] sm:$0xf0]  ;;  %v2139_v15 = vor.u32 %v2382_v12, %v2138_v11  ;;  %v2398_v16 = vld [vmem:[#allocation8 + $0x3a4] sm:$0xf0]  ;;  %v2058_v20 = vld [vmem:[#allocation8 + $0x280] sm:$0xf]  ;;  %v420_v24 = vpack.i.b16 %v410_v50, %v410_v50 }
  0x50   :  { %v2352_v44 = vld [vmem:[#allocation8 + $0x234] sm:$0xf0]  ;;  %v2227_v45 = vor.u32 %v2404_v42, %v2226_v40  ;;  %v2346_v19 = vld [vmem:[#allocation8 + $0x204] sm:$0xf0]  ;;  %v2130_v26 = vld [vmem:[#allocation8 + $0x310] sm:$0xf] }
  0x51   :  { %1349 = vmatpush.bf16.msra.mxu0 %v1747_v49  ;;  %1363 = vmatpush.bf16.msra.mxu1 %v1811_v51  ;;  %v2019_v46 = vor.u32 %v2352_v44, %v2018_v43  ;;  %v2083_v49 = vor.u32 %v2368_v48, %v2082_v47  ;;  %v2154_v51 = vld [vmem:[#allocation8 + $0x340] sm:$0xf]  ;;  %v2380_v27 = vld [vmem:[#allocation8 + $0x314] sm:$0xf0]  ;;  %v422_v33 = vperm.slane %v420_v24, 0  ;;  %s2570_s22 = smov 16  }
  0x52   :  { %v2155_v54 = vor.u32 %v2386_v52, %v2154_v51  ;;  %v2131_v28 = vor.u32 %v2380_v27, %v2130_v26  ;;  %v2396_v30 = vld [vmem:[#allocation8 + $0x394] sm:$0xf0]  ;;  %v412_v35 = vld [vmem:[#allocation1 + $0x1b] sm:$0xff]  ;;  %v2637_v11 = vld [vmem:[#allocation8 + $0x74] sm:$0xf] }
  0x53   :  { %1377 = vmatpush.bf16.msra.mxu2 %v1875_v55  ;;  %1391 = vmatpush.bf16.msra.mxu3 %v1939_v59  ;;  %v2402_v55 = vld [vmem:[#allocation8 + $0x3c4] sm:$0xf0]  ;;  %v2074_v59 = vld [vmem:[#allocation8 + $0x2a0] sm:$0xf]  ;;  %v458_v48 = vunpack.c.l.bf16 %v422_v33  ;;  %v2639_v12 = vld [vmem:[#allocation8 + $0x78] sm:$0xf0] }
  0x54   :  { %v2219_v56 = vor.u32 %v2402_v55, %v2218_v53  ;;  %v411_v34 = vld [vmem:[#allocation1 + $0x12] sm:$0xff]  ;;  %v2378_v37 = vld [vmem:[#allocation8 + $0x304] sm:$0xf0]  ;;  %v1799_v26 = vor.u32 %v2637_v11, %v2639_v12 }
  0x55   :  { %1350 = vmatpush.bf16.msra.mxu0 %v1739_v62  ;;  %1364 = vmatpush.bf16.msra.mxu1 %v1803_v63  ;;  %v2075_v62 = vor.u32 %v2366_v61, %v2074_v59  ;;  %v2146_v63 = vld [vmem:[#allocation8 + $0x330] sm:$0xf]  ;;  %v2394_v40 = vld [vmem:[#allocation8 + $0x384] sm:$0xf0]  ;;  %v423_v44 = vpack.i.b16 %v411_v34, %v411_v34  ;;  %v414_v55 = vld [vmem:[#allocation1 + $0x2d] sm:$0xff] }
  0x57   :  { %1378 = vmatpush.bf16.msra.mxu2 %v1867_v13  ;;  %1392 = vmatpush.bf16.msra.mxu3 %v1931_v14  ;;  %v2202_v13 = vld [vmem:[#allocation8 + $0x3a0] sm:$0xf]  ;;  %v409_v14 = vld [vmem:[#allocation1] sm:$0xff]  ;;  %v2631_v52 = vperm.slane %v423_v44, 0 }
  0x58   :  { %v417_v23 = vpack.i.b16 %v409_v14, %v409_v14 }
  0x59   :  { %1399 = vmatpush.bf16.msrb.mxu0 %v2051_v0  ;;  %1413 = vmatpush.bf16.msrb.mxu1 %v2115_v1  ;;  %v2384_v0 = vld [vmem:[#allocation8 + $0x334] sm:$0xf0]  ;;  %v2210_v1 = vld [vmem:[#allocation8 + $0x3b0] sm:$0xf] }
  0x5a   :  { %v2147_v2 = vor.u32 %v2384_v0, %v2146_v63  ;;  %v2211_v4 = vor.u32 %v2400_v3, %v2210_v1  ;;  %v432_v63 = vpack.i.b16 %v414_v55, %v414_v55  ;;  %v459_v1 = vunpack.c.l.bf16 %v2631_v52 }
  0x5b   :  { %1427 = vmatpush.bf16.msrb.mxu2 %v2179_v17  ;;  %1441 = vmatpush.bf16.msrb.mxu3 %v2243_v21  ;;  %v2203_v17 = vor.u32 %v2398_v16, %v2202_v13  ;;  %v1995_v21 = vor.u32 %v2346_v19, %v1994_v18  ;;  %v2645_v16 = vld [vmem:[#allocation8 + $0xf4] sm:$0xf] }
  0x5d   :  { %1400 = vmatpush.bf16.msrb.mxu0 %v2043_v5  ;;  %1414 = vmatpush.bf16.msrb.mxu1 %v2107_v9  ;;  %v2002_v5 = vld [vmem:[#allocation8 + $0x210] sm:$0xf]  ;;  %v2364_v9 = vld [vmem:[#allocation8 + $0x294] sm:$0xf0] }
  0x5e   :  { %v2003_v8 = vor.u32 %v2348_v6, %v2002_v5  ;;  %v2067_v10 = vor.u32 %v2364_v9, %v2066_v7  ;;  %v415_v5 = vld [vmem:[#allocation1 + $0x36] sm:$0xff] }
  0x5f   :  { %1428 = vmatpush.bf16.msrb.mxu2 %v2171_v29  ;;  %1442 = vmatpush.bf16.msrb.mxu3 %v2235_v32  ;;  %v2194_v29 = vld [vmem:[#allocation8 + $0x390] sm:$0xf]  ;;  %v419_v32 = vperm.slane %v417_v23, 0 }
  0x60   :  { %v2195_v31 = vor.u32 %v2396_v30, %v2194_v29 }
  0x61   :  { %1401 = vmatpush.bf16.msrb.mxu0 %v2035_v22  ;;  %1415 = vmatpush.bf16.msrb.mxu1 %v2099_v25  ;;  %v2362_v22 = vld [vmem:[#allocation8 + $0x284] sm:$0xf0]  ;;  %v457_v47 = vunpack.c.l.bf16 %v419_v32 }
  0x62   :  { %v2059_v25 = vor.u32 %v2362_v22, %v2058_v20  ;;  %v435_v20 = vpack.i.b16 %v415_v5, %v415_v5  ;;  %v2651_v22 = vld [vmem:[#allocation8 + $0x68] sm:$0xf0] }
  0x63   :  { %1429 = vmatpush.bf16.msrb.mxu2 %v2163_v41  ;;  %1443 = vmatpush.bf16.msrb.mxu3 %v2227_v45  ;;  %v426_v45 = vpack.i.b16 %v412_v35, %v412_v35 }
  0x65   :  { %1402 = vmatpush.bf16.msrb.mxu0 %v2027_v36  ;;  %1416 = vmatpush.bf16.msrb.mxu1 %v2091_v38  ;;  %v2122_v36 = vld [vmem:[#allocation8 + $0x300] sm:$0xf]  ;;  %v2633_v53 = vperm.slane %v426_v45, 0 }
  0x66   :  { %v2186_v38 = vld [vmem:[#allocation8 + $0x380] sm:$0xf]  ;;  %v2123_v39 = vor.u32 %v2378_v37, %v2122_v36 }
  0x67   :  { %1430 = vmatpush.bf16.msrb.mxu2 %v2155_v54  ;;  %1444 = vmatpush.bf16.msrb.mxu3 %v2219_v56  ;;  %v2187_v42 = vor.u32 %v2394_v40, %v2186_v38  ;;  %v413_v54 = vld [vmem:[#allocation1 + $0x24] sm:$0xff] }
  0x69   :  { %1403 = vmatpush.bf16.msrb.mxu0 %v2019_v46  ;;  %1417 = vmatpush.bf16.msrb.mxu1 %v2083_v49 }
  0x6b   :  { %1431 = vmatpush.bf16.msrb.mxu2 %v2147_v2  ;;  %1445 = vmatpush.bf16.msrb.mxu3 %v2211_v4  ;;  %v460_v2 = vunpack.c.l.bf16 %v2633_v53 }
  0x6d   :  { %1404 = vmatpush.bf16.msrb.mxu0 %v2011_v60  ;;  %1418 = vmatpush.bf16.msrb.mxu1 %v2075_v62  ;;  %v429_v62 = vpack.i.b16 %v413_v54, %v413_v54 }
  0x6f   :  { %1432 = vmatpush.bf16.msrb.mxu2 %v2139_v15  ;;  %1446 = vmatpush.bf16.msrb.mxu3 %v2203_v17  ;;  %v2641_v50 = vperm.slane %v429_v62, 0  ;;  %v2643_v15 = vperm.slane %v432_v63, 0  ;;  %v2647_v17 = vld [vmem:[#allocation8 + $0xf8] sm:$0xf0]  ;;  %v2669_v62 = vld [vmem:[#allocation8 + $0x174] sm:$0xf] }
  0x70   :  { %v2671_v63 = vld [vmem:[#allocation8 + $0x178] sm:$0xf0] }
  0x71   :  { %1405 = vmatpush.bf16.msrb.mxu0 %v2003_v8  ;;  %1419 = vmatpush.bf16.msrb.mxu1 %v2067_v10  ;;  %v416_v10 = vld [vmem:[#allocation1 + $0x3f] sm:$0xff]  ;;  %v461_v35 = vunpack.c.l.bf16 %v2641_v50  ;;  %v462_v36 = vunpack.c.l.bf16 %v2643_v15 }
  0x72   :  { %v2305_v15 = vld [vmem:[#allocation8 + $0xc4] sm:$0xf] }
  0x73   :  { %1433 = vmatpush.bf16.msrb.mxu2 %v2131_v28  ;;  %1447 = vmatpush.bf16.msrb.mxu3 %v2195_v31  ;;  %v1863_v31 = vor.u32 %v2645_v16, %v2647_v17 }
  0x75   :  { %1406 = vmatpush.bf16.msrb.mxu0 %v1995_v21  ;;  %1420 = vmatpush.bf16.msrb.mxu1 %v2059_v25  ;;  %v2649_v21 = vld [vmem:[#allocation8 + $0x64] sm:$0xf]  ;;  %v438_v25 = vpack.i.b16 %v416_v10, %v416_v10 }
  0x76   :  { %v1791_v37 = vor.u32 %v2649_v21, %v2651_v22 }
  0x77   :  { %1434 = vmatpush.bf16.msrb.mxu2 %v2123_v39  ;;  %1448 = vmatpush.bf16.msrb.mxu3 %v2187_v42  ;;  %v2661_v42 = vperm.slane %v435_v20, 0 }
  0xa5   :  { %v295_v41 = vpop.f32.mrf.mxu0  ;;  %v309_v43 = vpop.f32.mrf.mxu1 }
  0xa6   :  { %v398_v46 = vpack.c.bf16 %v309_v43, %v295_v41 }
  0xa8   :  { %v441_v49 = vunpack.c.l.bf16 %v398_v46  ;;  %v442_v51 = vunpack.c.h.bf16 %v398_v46  ;;  %v2663_v46 = vperm.slane %v438_v25, 0 }
  0xaa   :  { %v465_v56 = vadd.f32 %v457_v47, %v441_v49  ;;  %v466_v57 = vadd.f32 %v458_v48, %v442_v51 }
  0xac   :  { %v481_v59 = vpack.c.bf16 %v466_v57, %v465_v56  ;;  %v2665_v56 = vld [vmem:[#allocation8 + $0xe4] sm:$0xf]  ;;  %v2667_v57 = vld [vmem:[#allocation8 + $0xe8] sm:$0xf0] }
  0xad   :  { %v323_v58 = vpop.f32.mrf.mxu2  ;;  %v337_v60 = vpop.f32.mrf.mxu3  ;;  %v1855_v10 = vor.u32 %v2665_v56, %v2667_v57  ;;  %v2341_v56 = vld [vmem:[#allocation8 + $0x1e4] sm:$0xf]  ;;  %v1980_v57 = vld [vmem:[#allocation8 + $0x1e8] sm:$0xf0] }
  0xae   :  { %v297_v61 = vpop.f32.mrf.mxu0  ;;  %v399_v0 = vpack.c.bf16 %v337_v60, %v323_v58  ;;  %v311_v3 = vpop.f32.mrf.mxu1  ;;  %v489_v6 = vunpack.c.l.bf16 %v481_v59  ;;  %v490_v7 = vunpack.c.h.bf16 %v481_v59  ;;  %v1983_v22 = vor.u32 %v2341_v56, %v1980_v57  ;;  %v2319_v56 = vld [vmem:[#allocation8 + $0x134] sm:$0xf]  ;;  %v1892_v57 = vld [vmem:[#allocation8 + $0x138] sm:$0xf0] }
  0xaf   :  { %v402_v4 = vpack.c.bf16 %v311_v3, %v297_v61 }
  0xb0   :  { %v443_v8 = vunpack.c.l.bf16 %v399_v0  ;;  %v444_v9 = vunpack.c.h.bf16 %v399_v0  ;;  %v505_v27 = vmul.f32 0.20019531, %v489_v6  ;;  %v506_v28 = vmul.f32 0.20019531, %v490_v7 }
  0xb1   :  { %v449_v13 = vunpack.c.l.bf16 %v402_v4  ;;  %v450_v14 = vunpack.c.h.bf16 %v402_v4 }
  0xb2   :  { %v467_v18 = vadd.f32 %v459_v1, %v443_v8  ;;  %v468_v19 = vadd.f32 %v460_v2, %v444_v9  ;;  %v545_v49 = vmax.f32 %v489_v6, %v505_v27  ;;  %v546_v51 = vmax.f32 %v490_v7, %v506_v28  ;;  %v2677_v6 = vld [vmem:[#allocation8 + $0x1f4] sm:$0xf]  ;;  %v2679_v7 = vld [vmem:[#allocation8 + $0x1f8] sm:$0xf0] }
  0xb3   :  { %v473_v23 = vadd.f32 %v457_v47, %v449_v13  ;;  %v474_v24 = vadd.f32 %v458_v48, %v450_v14 }
  0xb4   :  { %v482_v29 = vpack.c.bf16 %v468_v19, %v467_v18 }
  0xb5   :  { %v325_v30 = vpop.f32.mrf.mxu2  ;;  %v485_v32 = vpack.c.bf16 %v474_v24, %v473_v23  ;;  %v339_v33 = vpop.f32.mrf.mxu3  ;;  %v1927_v23 = vor.u32 %v2669_v62, %v2671_v63 }
  0xb6   :  { %v351_v34 = vpop.f32.mrf.mxu0  ;;  %v491_v38 = vunpack.c.l.bf16 %v482_v29  ;;  %v492_v39 = vunpack.c.h.bf16 %v482_v29  ;;  %v403_v40 = vpack.c.bf16 %v339_v33, %v325_v30  ;;  %v365_v41 = vpop.f32.mrf.mxu1  ;;  %v1991_v29 = vor.u32 %v2677_v6, %v2679_v7 }
  0xb7   :  { %v497_v43 = vunpack.c.l.bf16 %v485_v32  ;;  %v498_v44 = vunpack.c.h.bf16 %v485_v32  ;;  %v400_v45 = vpack.c.bf16 %v365_v41, %v351_v34  ;;  %v2291_v34 = vld [vmem:[#allocation8 + $0x54] sm:$0xf] }
  0xb8   :  { %v451_v47 = vunpack.c.l.bf16 %v403_v40  ;;  %v452_v48 = vunpack.c.h.bf16 %v403_v40  ;;  %v507_v58 = vmul.f32 0.20019531, %v491_v38  ;;  %v508_v59 = vmul.f32 0.20019531, %v492_v39  ;;  %v1780_v40 = vld [vmem:[#allocation8 + $0x58] sm:$0xf0] }
  0xb9   :  { %v513_v52 = vmul.f32 0.20019531, %v497_v43  ;;  %v514_v53 = vmul.f32 0.20019531, %v498_v44  ;;  %v445_v54 = vunpack.c.l.bf16 %v400_v45  ;;  %v446_v55 = vunpack.c.h.bf16 %v400_v45 }
  0xba   :  { %v475_v60 = vadd.f32 %v459_v1, %v451_v47  ;;  %v476_v61 = vadd.f32 %v460_v2, %v452_v48  ;;  %v463_v1 = vunpack.c.l.bf16 %v2661_v42  ;;  %v464_v2 = vunpack.c.l.bf16 %v2663_v46  ;;  %v2307_v47 = vld [vmem:[#allocation8 + $0xd4] sm:$0xf]  ;;  %v1844_v48 = vld [vmem:[#allocation8 + $0xd8] sm:$0xf0]  ;;  %v2337_v42 = vld [vmem:[#allocation8 + $0x1c4] sm:$0xf] }
  0xbb   :  { %v469_v0 = vadd.f32 %v461_v35, %v445_v54  ;;  %v470_v3 = vadd.f32 %v462_v36, %v446_v55  ;;  %v553_v4 = vmax.f32 %v497_v43, %v513_v52  ;;  %v554_v5 = vmax.f32 %v498_v44, %v514_v53  ;;  %v1916_v54 = vld [vmem:[#allocation8 + $0x168] sm:$0xf0] }
  0xbc   :  { %v486_v8 = vpack.c.bf16 %v476_v61, %v475_v60  ;;  %v547_v32 = vmax.f32 %v491_v38, %v507_v58  ;;  %v548_v33 = vmax.f32 %v492_v39, %v508_v59  ;;  %v1847_v55 = vor.u32 %v2307_v47, %v1844_v48  ;;  %v2289_v58 = vld [vmem:[#allocation8 + $0x44] sm:$0xf] }
  0xbd   :  { %v379_v9 = vpop.f32.mrf.mxu2  ;;  %v2685_v13 = vpack.c.bf16 %v470_v3, %v469_v0  ;;  %v393_v14 = vpop.f32.mrf.mxu3  ;;  %v2687_v19 = vpack.c.bf16 %v553_v4, %v545_v49  ;;  %v2689_v20 = vpack.c.bf16 %v554_v5, %v546_v51  ;;  %v2321_v48 = vld [vmem:[#allocation8 + $0x144] sm:$0xf] }
  0xbe   :  { %v353_v18 = vpop.f32.mrf.mxu0  ;;  %v499_v24 = vunpack.c.l.bf16 %v486_v8  ;;  %v500_v25 = vunpack.c.h.bf16 %v486_v8  ;;  %v401_v27 = vpack.c.bf16 %v393_v14, %v379_v9  ;;  %v367_v28 = vpop.f32.mrf.mxu1  ;;  %v2323_v8 = vld [vmem:[#allocation8 + $0x154] sm:$0xf]  ;;  %v1908_v9 = vld [vmem:[#allocation8 + $0x158] sm:$0xf0] }
  0xbf   :  { %v404_v30 = vpack.c.bf16 %v367_v28, %v353_v18  ;;  %1351 = vmatmul.bf16.vlgmr.msra.gmra.mxu0 %v2687_v19  ;;  %1365 = vmatmul.bf16.vlgmr.msra.gmra.mxu1 %v2689_v20  ;;  %v493_v49 = vunpack.c.l.bf16 %v2685_v13  ;;  %v494_v38 = vunpack.c.h.bf16 %v2685_v13 }
  0xc0   :  { %v515_v41 = vmul.f32 0.20019531, %v499_v24  ;;  %v516_v43 = vmul.f32 0.20019531, %v500_v25  ;;  %v447_v44 = vunpack.c.l.bf16 %v401_v27  ;;  %v448_v45 = vunpack.c.h.bf16 %v401_v27  ;;  %1455 = vmatpush.bf16.msra.mxu0 %v1799_v26  ;;  %1469 = vmatpush.bf16.msra.mxu1 %v1863_v31  ;;  %v2325_v26 = vld [vmem:[#allocation8 + $0x164] sm:$0xf] }
  0xc1   :  { %v453_v39 = vunpack.c.l.bf16 %v404_v30  ;;  %v454_v51 = vunpack.c.h.bf16 %v404_v30  ;;  %v1783_v31 = vor.u32 %v2291_v34, %v1780_v40  ;;  %v509_v62 = vmul.f32 0.20019531, %v493_v49  ;;  %v1764_v40 = vld [vmem:[#allocation8 + $0x38] sm:$0xf0] }
  0xc2   :  { %v471_v52 = vadd.f32 %v463_v1, %v447_v44  ;;  %v472_v53 = vadd.f32 %v464_v2, %v448_v45  ;;  %v555_v11 = vmax.f32 %v499_v24, %v515_v41  ;;  %v556_v12 = vmax.f32 %v500_v25, %v516_v43  ;;  %v2339_v24 = vld [vmem:[#allocation8 + $0x1d4] sm:$0xf]  ;;  %v1972_v25 = vld [vmem:[#allocation8 + $0x1d8] sm:$0xf0] }
  0xc3   :  { %v477_v16 = vadd.f32 %v461_v35, %v453_v39  ;;  %v478_v17 = vadd.f32 %v462_v36, %v454_v51  ;;  %v1772_v35 = vld [vmem:[#allocation8 + $0x48] sm:$0xf0]  ;;  %v510_v63 = vmul.f32 0.20019531, %v494_v38  ;;  %v1919_v21 = vor.u32 %v2325_v26, %v1916_v54  ;;  %v2303_v41 = vld [vmem:[#allocation8 + $0xb4] sm:$0xf] }
  0xc4   :  { %v2713_v59 = vpack.c.bf16 %v472_v53, %v471_v52  ;;  %1456 = vmatpush.bf16.msra.mxu0 %v1791_v37  ;;  %1470 = vmatpush.bf16.msra.mxu1 %v1855_v10  ;;  %v2718_v61 = vpack.c.bf16 %v555_v11, %v547_v32  ;;  %v2720_v50 = vpack.c.bf16 %v556_v12, %v548_v33  ;;  %v1836_v36 = vld [vmem:[#allocation8 + $0xc8] sm:$0xf0]  ;;  %v1828_v43 = vld [vmem:[#allocation8 + $0xb8] sm:$0xf0]  ;;  %v2285_v11 = vld [vmem:[#allocation8 + $0x24] sm:$0xf] }
  0xc5   :  { %v381_v60 = vpop.f32.mrf.mxu2  ;;  %v487_v0 = vpack.c.bf16 %v478_v17, %v477_v16  ;;  %v395_v3 = vpop.f32.mrf.mxu3  ;;  %v1775_v6 = vor.u32 %v2289_v58, %v1772_v35  ;;  %v1839_v7 = vor.u32 %v2305_v15, %v1836_v36  ;;  %v549_v30 = vmax.f32 %v493_v49, %v509_v62  ;;  %v1900_v39 = vld [vmem:[#allocation8 + $0x148] sm:$0xf0]  ;;  %v2301_v16 = vld [vmem:[#allocation8 + $0xa4] sm:$0xf]  ;;  %v2335_v15 = vld [vmem:[#allocation8 + $0x1b4] sm:$0xf] }
  0xc6   :  { %v405_v4 = vpack.c.bf16 %v395_v3, %v381_v60  ;;  %1379 = vmatmul.bf16.vlgmr.msra.gmra.mxu2 %v2718_v61  ;;  %1393 = vmatmul.bf16.vlgmr.msra.gmra.mxu3 %v2720_v50  ;;  %v495_v10 = vunpack.c.l.bf16 %v2713_v59  ;;  %v496_v13 = vunpack.c.h.bf16 %v2713_v59  ;;  %v550_v32 = vmax.f32 %v494_v38, %v510_v63  ;;  %v1756_v54 = vld [vmem:[#allocation8 + $0x28] sm:$0xf0]  ;;  %v1956_v36 = vld [vmem:[#allocation8 + $0x1b8] sm:$0xf0] }
  0xc7   :  { %v501_v37 = vunpack.c.l.bf16 %v487_v0  ;;  %v502_v5 = vunpack.c.h.bf16 %v487_v0  ;;  %1483 = vmatpush.bf16.msra.mxu2 %v1927_v23  ;;  %1497 = vmatpush.bf16.msra.mxu3 %v1991_v29  ;;  %v2287_v23 = vld [vmem:[#allocation8 + $0x34] sm:$0xf]  ;;  %v1911_v34 = vor.u32 %v2323_v8, %v1908_v9  ;;  %v1975_v44 = vor.u32 %v2339_v24, %v1972_v25  ;;  %v1820_v17 = vld [vmem:[#allocation8 + $0xa8] sm:$0xf0]  ;;  %v2281_v25 = vld [vmem:[#allocation8 + $0x4] sm:$0xf] }
  0xc8   :  { %v455_v14 = vunpack.c.l.bf16 %v405_v4  ;;  %v456_v18 = vunpack.c.h.bf16 %v405_v4  ;;  %1457 = vmatpush.bf16.msra.mxu0 %v1783_v31  ;;  %1471 = vmatpush.bf16.msra.mxu1 %v1847_v55  ;;  %v511_v49 = vmul.f32 0.20019531, %v495_v10  ;;  %v512_v38 = vmul.f32 0.20019531, %v496_v13  ;;  %v2283_v0 = vld [vmem:[#allocation8 + $0x14] sm:$0xf] }
  0xc9   :  { %v517_v27 = vmul.f32 0.20019531, %v501_v37  ;;  %v518_v28 = vmul.f32 0.20019531, %v502_v5  ;;  %v1767_v52 = vor.u32 %v2287_v23, %v1764_v40  ;;  %v1831_v53 = vor.u32 %v2303_v41, %v1828_v43  ;;  %v2052_v23 = vld [vmem:[#allocation8 + $0x278] sm:$0xf0]  ;;  %v2315_v41 = vld [vmem:[#allocation8 + $0x114] sm:$0xf] }
  0xca   :  { %v479_v29 = vadd.f32 %v463_v1, %v455_v14  ;;  %v480_v33 = vadd.f32 %v464_v2, %v456_v18  ;;  %v1964_v1 = vld [vmem:[#allocation8 + $0x1c8] sm:$0xf0]  ;;  %v1903_v31 = vor.u32 %v2321_v48, %v1900_v39  ;;  %v551_v60 = vmax.f32 %v495_v10, %v511_v49  ;;  %v2116_v40 = vld [vmem:[#allocation8 + $0x2f8] sm:$0xf0] }
  0xcb   :  { %1484 = vmatpush.bf16.msra.mxu2 %v1919_v21  ;;  %1498 = vmatpush.bf16.msra.mxu3 %v1983_v22  ;;  %v557_v45 = vmax.f32 %v501_v37, %v517_v27  ;;  %v558_v47 = vmax.f32 %v502_v5, %v518_v28  ;;  %v1967_v55 = vor.u32 %v2337_v42, %v1964_v1  ;;  %v1748_v21 = vld [vmem:[#allocation8 + $0x18] sm:$0xf0]  ;;  %v2299_v22 = vld [vmem:[#allocation8 + $0x94] sm:$0xf]  ;;  %v1884_v10 = vld [vmem:[#allocation8 + $0x128] sm:$0xf0] }
  0xcc   :  { %v488_v51 = vpack.c.bf16 %v480_v33, %v479_v29  ;;  %1458 = vmatpush.bf16.msra.mxu0 %v1775_v6  ;;  %1472 = vmatpush.bf16.msra.mxu1 %v1839_v7  ;;  %v552_v35 = vmax.f32 %v496_v13, %v512_v38  ;;  %v1759_v62 = vor.u32 %v2285_v11, %v1756_v54  ;;  %v1812_v37 = vld [vmem:[#allocation8 + $0x98] sm:$0xf0]  ;;  %v2317_v7 = vld [vmem:[#allocation8 + $0x124] sm:$0xf]  ;;  %v1948_v14 = vld [vmem:[#allocation8 + $0x1a8] sm:$0xf0] }
  0xcd   :  { %v2730_v46 = vpack.c.bf16 %v557_v45, %v549_v30  ;;  %v2732_v2 = vpack.c.bf16 %v558_v47, %v550_v32  ;;  %v1823_v63 = vor.u32 %v2301_v16, %v1820_v17  ;;  %v1895_v5 = vor.u32 %v2319_v56, %v1892_v57  ;;  %v2333_v13 = vld [vmem:[#allocation8 + $0x1a4] sm:$0xf]  ;;  %v1740_v27 = vld [vmem:[#allocation8 + $0x8] sm:$0xf0]  ;;  %v2359_v32 = vld [vmem:[#allocation8 + $0x274] sm:$0xf] }
  0xce   :  { %v503_v12 = vunpack.c.l.bf16 %v488_v51  ;;  %v504_v26 = vunpack.c.h.bf16 %v488_v51  ;;  %v1959_v6 = vor.u32 %v2335_v15, %v1956_v36  ;;  %v1751_v18 = vor.u32 %v2283_v0, %v1748_v21  ;;  %v2297_v28 = vld [vmem:[#allocation8 + $0x84] sm:$0xf]  ;;  %v1804_v30 = vld [vmem:[#allocation8 + $0x88] sm:$0xf0]  ;;  %v1876_v43 = vld [vmem:[#allocation8 + $0x118] sm:$0xf0] }
  0xcf   :  { %1485 = vmatpush.bf16.msra.mxu2 %v1911_v34  ;;  %1499 = vmatpush.bf16.msra.mxu3 %v1975_v44  ;;  %v1815_v24 = vor.u32 %v2299_v22, %v1812_v37  ;;  %v1887_v29 = vor.u32 %v2317_v7, %v1884_v10  ;;  %v1951_v33 = vor.u32 %v2333_v13, %v1948_v14  ;;  %v2375_v34 = vld [vmem:[#allocation8 + $0x2f4] sm:$0xf]  ;;  %v1940_v45 = vld [vmem:[#allocation8 + $0x198] sm:$0xf0]  ;;  %v2357_v38 = vld [vmem:[#allocation8 + $0x264] sm:$0xf] }
  0xd0   :  { %v519_v58 = vmul.f32 0.20019531, %v503_v12  ;;  %v520_v59 = vmul.f32 0.20019531, %v504_v26  ;;  %1407 = vmatmul.bf16.vlgmr.msrb.gmra.mxu0 %v2730_v46  ;;  %1421 = vmatmul.bf16.vlgmr.msrb.gmra.mxu1 %v2732_v2  ;;  %v2331_v44 = vld [vmem:[#allocation8 + $0x194] sm:$0xf]  ;;  %v1743_v47 = vor.u32 %v2281_v25, %v1740_v27  ;;  %v1807_v48 = vor.u32 %v2297_v28, %v1804_v30  ;;  %v2044_v51 = vld [vmem:[#allocation8 + $0x268] sm:$0xf0] }
  0xd1   :  { %1459 = vmatpush.bf16.msra.mxu0 %v1767_v52  ;;  %1473 = vmatpush.bf16.msra.mxu1 %v1831_v53  ;;  %v2055_v39 = vor.u32 %v2359_v32, %v2052_v23  ;;  %v2119_v49 = vor.u32 %v2375_v34, %v2116_v40  ;;  %v2373_v42 = vld [vmem:[#allocation8 + $0x2e4] sm:$0xf]  ;;  %v1879_v1 = vor.u32 %v2315_v41, %v1876_v43  ;;  %v2108_v53 = vld [vmem:[#allocation8 + $0x2e8] sm:$0xf0]  ;;  %v2391_v16 = vld [vmem:[#allocation8 + $0x374] sm:$0xf] }
  0xd2   :  { %v559_v3 = vmax.f32 %v503_v12, %v519_v58  ;;  %v560_v4 = vmax.f32 %v504_v26, %v520_v59  ;;  %v1943_v52 = vor.u32 %v2331_v44, %v1940_v45  ;;  %v2313_v11 = vld [vmem:[#allocation8 + $0x104] sm:$0xf]  ;;  %v1868_v12 = vld [vmem:[#allocation8 + $0x108] sm:$0xf0]  ;;  %v2180_v17 = vld [vmem:[#allocation8 + $0x378] sm:$0xf0]  ;;  %v2047_v56 = vor.u32 %v2357_v38, %v2044_v51 }
  0xd3   :  { %1486 = vmatpush.bf16.msra.mxu2 %v1903_v31  ;;  %1500 = vmatpush.bf16.msra.mxu3 %v1967_v55  ;;  %v2329_v26 = vld [vmem:[#allocation8 + $0x184] sm:$0xf]  ;;  %v1932_v54 = vld [vmem:[#allocation8 + $0x188] sm:$0xf0]  ;;  %v2407_v31 = vld [vmem:[#allocation8 + $0x3f4] sm:$0xf]  ;;  %v2111_v57 = vor.u32 %v2373_v42, %v2108_v53  ;;  %v1871_v59 = vor.u32 %v2313_v11, %v1868_v12 }
  0xd4   :  { %v2736_v8 = vpack.c.bf16 %v559_v3, %v551_v60  ;;  %v2738_v9 = vpack.c.bf16 %v560_v4, %v552_v35  ;;  %v2244_v55 = vld [vmem:[#allocation8 + $0x3f8] sm:$0xf0]  ;;  %v2355_v58 = vld [vmem:[#allocation8 + $0x254] sm:$0xf]  ;;  %v1935_v60 = vor.u32 %v2329_v26, %v1932_v54  ;;  %v2389_v0 = vld [vmem:[#allocation8 + $0x364] sm:$0xf] }
  0xd5   :  { %1460 = vmatpush.bf16.msra.mxu0 %v1759_v62  ;;  %1474 = vmatpush.bf16.msra.mxu1 %v1823_v63  ;;  %v2036_v35 = vld [vmem:[#allocation8 + $0x258] sm:$0xf0]  ;;  %v2371_v15 = vld [vmem:[#allocation8 + $0x2d4] sm:$0xf]  ;;  %v2183_v62 = vor.u32 %v2391_v16, %v2180_v17  ;;  %v2247_v63 = vor.u32 %v2407_v31, %v2244_v55  ;;  %v2172_v3 = vld [vmem:[#allocation8 + $0x368] sm:$0xf0] }
  0xd6   :  { %1435 = vmatmul.bf16.vlgmr.msrb.gmra.mxu2 %v2736_v8  ;;  %1449 = vmatmul.bf16.vlgmr.msrb.gmra.mxu3 %v2738_v9  ;;  %v2100_v36 = vld [vmem:[#allocation8 + $0x2d8] sm:$0xf0]  ;;  %v2405_v4 = vld [vmem:[#allocation8 + $0x3e4] sm:$0xf]  ;;  %v2236_v21 = vld [vmem:[#allocation8 + $0x3e8] sm:$0xf0]  ;;  %v2039_v22 = vor.u32 %v2355_v58, %v2036_v35 }
  0xd7   :  { %1487 = vmatpush.bf16.msra.mxu2 %v1895_v5  ;;  %1501 = vmatpush.bf16.msra.mxu3 %v1959_v6  ;;  %v2103_v37 = vor.u32 %v2371_v15, %v2100_v36  ;;  %v2353_v5 = vld [vmem:[#allocation8 + $0x244] sm:$0xf]  ;;  %v2028_v6 = vld [vmem:[#allocation8 + $0x248] sm:$0xf0]  ;;  %v2387_v13 = vld [vmem:[#allocation8 + $0x354] sm:$0xf] }
  0xd8   :  { %v2369_v7 = vld [vmem:[#allocation8 + $0x2c4] sm:$0xf]  ;;  %v2092_v10 = vld [vmem:[#allocation8 + $0x2c8] sm:$0xf0]  ;;  %v2164_v14 = vld [vmem:[#allocation8 + $0x358] sm:$0xf0]  ;;  %v2031_v25 = vor.u32 %v2353_v5, %v2028_v6 }
  0xd9   :  { %1461 = vmatpush.bf16.msra.mxu0 %v1751_v18  ;;  %1475 = vmatpush.bf16.msra.mxu1 %v1815_v24  ;;  %v2403_v18 = vld [vmem:[#allocation8 + $0x3d4] sm:$0xf]  ;;  %v2228_v24 = vld [vmem:[#allocation8 + $0x3d8] sm:$0xf0]  ;;  %v2095_v27 = vor.u32 %v2369_v7, %v2092_v10  ;;  %v2385_v34 = vld [vmem:[#allocation8 + $0x344] sm:$0xf] }
  0xda   :  { %v2351_v28 = vld [vmem:[#allocation8 + $0x234] sm:$0xf]  ;;  %v2020_v30 = vld [vmem:[#allocation8 + $0x238] sm:$0xf0]  ;;  %v2156_v40 = vld [vmem:[#allocation8 + $0x348] sm:$0xf0] }
  0xdb   :  { %1488 = vmatpush.bf16.msra.mxu2 %v1887_v29  ;;  %1502 = vmatpush.bf16.msra.mxu3 %v1951_v33  ;;  %v2367_v32 = vld [vmem:[#allocation8 + $0x2b4] sm:$0xf]  ;;  %v2084_v23 = vld [vmem:[#allocation8 + $0x2b8] sm:$0xf0]  ;;  %v2167_v29 = vor.u32 %v2387_v13, %v2164_v14  ;;  %v2231_v33 = vor.u32 %v2403_v18, %v2228_v24  ;;  %v2401_v41 = vld [vmem:[#allocation8 + $0x3c4] sm:$0xf]  ;;  %v2023_v44 = vor.u32 %v2351_v28, %v2020_v30 }
  0xdc   :  { %v2220_v43 = vld [vmem:[#allocation8 + $0x3c8] sm:$0xf0]  ;;  %v2087_v45 = vor.u32 %v2367_v32, %v2084_v23  ;;  %v2383_v38 = vld [vmem:[#allocation8 + $0x334] sm:$0xf]  ;;  %v2148_v51 = vld [vmem:[#allocation8 + $0x338] sm:$0xf0] }
  0xdd   :  { %1462 = vmatpush.bf16.msra.mxu0 %v1743_v47  ;;  %1476 = vmatpush.bf16.msra.mxu1 %v1807_v48  ;;  %v2349_v47 = vld [vmem:[#allocation8 + $0x224] sm:$0xf]  ;;  %v2012_v48 = vld [vmem:[#allocation8 + $0x228] sm:$0xf0]  ;;  %v2399_v42 = vld [vmem:[#allocation8 + $0x3b4] sm:$0xf]  ;;  %v2151_v16 = vor.u32 %v2383_v38, %v2148_v51 }
  0xde   :  { %v2347_v11 = vld [vmem:[#allocation8 + $0x214] sm:$0xf]  ;;  %v2004_v12 = vld [vmem:[#allocation8 + $0x218] sm:$0xf0]  ;;  %v2381_v31 = vld [vmem:[#allocation8 + $0x324] sm:$0xf] }
  0xdf   :  { %1489 = vmatpush.bf16.msra.mxu2 %v1879_v1  ;;  %1503 = vmatpush.bf16.msra.mxu3 %v1943_v52  ;;  %v2212_v1 = vld [vmem:[#allocation8 + $0x3b8] sm:$0xf0]  ;;  %v2015_v52 = vor.u32 %v2349_v47, %v2012_v48  ;;  %v2363_v26 = vld [vmem:[#allocation8 + $0x294] sm:$0xf]  ;;  %v2140_v55 = vld [vmem:[#allocation8 + $0x328] sm:$0xf0]  ;;  %v2007_v58 = vor.u32 %v2347_v11, %v2004_v12 }
  0xe0   :  { %1463 = vmatmul.bf16.vlgmr.msra.gmra.mxu0 %v2687_v19  ;;  %1477 = vmatmul.bf16.vlgmr.msra.gmra.mxu1 %v2689_v20  ;;  %v2175_v19 = vor.u32 %v2389_v0, %v2172_v3  ;;  %v2239_v20 = vor.u32 %v2405_v4, %v2236_v21  ;;  %v2068_v54 = vld [vmem:[#allocation8 + $0x298] sm:$0xf0]  ;;  %v2215_v17 = vor.u32 %v2399_v42, %v2212_v1  ;;  %v1996_v35 = vld [vmem:[#allocation8 + $0x208] sm:$0xf0]  ;;  %v2361_v15 = vld [vmem:[#allocation8 + $0x284] sm:$0xf] }
  0xe1   :  { %1511 = vmatpush.bf16.msrb.mxu0 %v2055_v39  ;;  %1525 = vmatpush.bf16.msrb.mxu1 %v2119_v49  ;;  %v2076_v39 = vld [vmem:[#allocation8 + $0x2a8] sm:$0xf0]  ;;  %v2223_v49 = vor.u32 %v2401_v41, %v2220_v43  ;;  %v2379_v0 = vld [vmem:[#allocation8 + $0x314] sm:$0xf]  ;;  %v2132_v3 = vld [vmem:[#allocation8 + $0x318] sm:$0xf0] }
  0xe2   :  { %v2060_v36 = vld [vmem:[#allocation8 + $0x288] sm:$0xf0]  ;;  %v2395_v4 = vld [vmem:[#allocation8 + $0x394] sm:$0xf]  ;;  %v2196_v21 = vld [vmem:[#allocation8 + $0x398] sm:$0xf0]  ;;  %v2135_v5 = vor.u32 %v2379_v0, %v2132_v3 }
  0xe3   :  { %1490 = vmatpush.bf16.msra.mxu2 %v1871_v59  ;;  %1504 = vmatpush.bf16.msra.mxu3 %v1935_v60  ;;  %v2071_v59 = vor.u32 %v2363_v26, %v2068_v54  ;;  %v2345_v60 = vld [vmem:[#allocation8 + $0x204] sm:$0xf]  ;;  %v2199_v6 = vor.u32 %v2395_v4, %v2196_v21  ;;  %v2124_v10 = vld [vmem:[#allocation8 + $0x308] sm:$0xf0]  ;;  %v697_v24 = vld [vmem:[%s2760_s4] sm:$0x3] }
  0xe4   :  { %v2377_v7 = vld [vmem:[#allocation8 + $0x304] sm:$0xf]  ;;  %s2568_s4 = smov [#allocation10]  }
  0xe5   :  { %1512 = vmatpush.bf16.msrb.mxu0 %v2047_v56  ;;  %1526 = vmatpush.bf16.msrb.mxu1 %v2111_v57  ;;  %v2397_v56 = vld [vmem:[#allocation8 + $0x3a4] sm:$0xf]  ;;  %v2204_v57 = vld [vmem:[#allocation8 + $0x3a8] sm:$0xf0]  ;;  %v2127_v13 = vor.u32 %v2377_v7, %v2124_v10  ;;  %s1579_s17 = sshll.u32 %s2568_s4, 4  ;;  %s1580_s17 = int_to_ptr.vmem [resolvable:$true] %s1579_s17 }
  0xe6   :  { %1491 = vmatmul.bf16.vlgmr.msra.gmra.mxu2 %v2718_v61  ;;  %1505 = vmatmul.bf16.vlgmr.msra.gmra.mxu3 %v2720_v50  ;;  %v2365_v61 = vld [vmem:[#allocation8 + $0x2a4] sm:$0xf]  ;;  %v2159_v50 = vor.u32 %v2385_v34, %v2156_v40 }
  0xe7   :  { %1539 = vmatpush.bf16.msrb.mxu2 %v2183_v62  ;;  %1553 = vmatpush.bf16.msrb.mxu3 %v2247_v63  ;;  %v2079_v53 = vor.u32 %v2365_v61, %v2076_v39  ;;  %v2143_v62 = vor.u32 %v2381_v31, %v2140_v55  ;;  %v2207_v63 = vor.u32 %v2397_v56, %v2204_v57  ;;  %v700_v31 = vperm.slane %v697_v24, 1 }
  0xe9   :  { %1513 = vmatpush.bf16.msrb.mxu0 %v2039_v22  ;;  %1527 = vmatpush.bf16.msrb.mxu1 %v2103_v37  ;;  %v1999_v22 = vor.u32 %v2345_v60, %v1996_v35  ;;  %v2063_v37 = vor.u32 %v2361_v15, %v2060_v36 }
  0xeb   :  { %1540 = vmatpush.bf16.msrb.mxu2 %v2175_v19  ;;  %1554 = vmatpush.bf16.msrb.mxu3 %v2239_v20  ;;  %v2393_v19 = vld [vmem:[#allocation8 + $0x384] sm:$0xf]  ;;  %v2188_v20 = vld [vmem:[#allocation8 + $0x388] sm:$0xf0] }
  0xec   :  { %v2191_v14 = vor.u32 %v2393_v19, %v2188_v20 }
  0xed   :  { %1514 = vmatpush.bf16.msrb.mxu0 %v2031_v25  ;;  %1528 = vmatpush.bf16.msrb.mxu1 %v2095_v27  ;;  %v699_v27 = vperm.slane %v697_v24, 0 }
  0xef   :  { %1541 = vmatpush.bf16.msrb.mxu2 %v2167_v29  ;;  %1555 = vmatpush.bf16.msrb.mxu3 %v2231_v33 }
  0xf1   :  { %1515 = vmatpush.bf16.msrb.mxu0 %v2023_v44  ;;  %1529 = vmatpush.bf16.msrb.mxu1 %v2087_v45 }
  0xf3   :  { %1542 = vmatpush.bf16.msrb.mxu2 %v2159_v50  ;;  %1556 = vmatpush.bf16.msrb.mxu3 %v2223_v49 }
  0xf5   :  { %1516 = vmatpush.bf16.msrb.mxu0 %v2015_v52  ;;  %1530 = vmatpush.bf16.msrb.mxu1 %v2079_v53 }
  0xf7   :  { %1543 = vmatpush.bf16.msrb.mxu2 %v2151_v16  ;;  %1557 = vmatpush.bf16.msrb.mxu3 %v2215_v17 }
  0xf9   :  { %1517 = vmatpush.bf16.msrb.mxu0 %v2007_v58  ;;  %1531 = vmatpush.bf16.msrb.mxu1 %v2071_v59 }
  0xfb   :  { %1544 = vmatpush.bf16.msrb.mxu2 %v2143_v62  ;;  %1558 = vmatpush.bf16.msrb.mxu3 %v2207_v63 }
  0xfd   :  { %1518 = vmatpush.bf16.msrb.mxu0 %v1999_v22  ;;  %1532 = vmatpush.bf16.msrb.mxu1 %v2063_v37 }
  0xff   :  { %1545 = vmatpush.bf16.msrb.mxu2 %v2135_v5  ;;  %1559 = vmatpush.bf16.msrb.mxu3 %v2199_v6 }
 0x100   :  { %1519 = vmatmul.bf16.vlgmr.msrb.gmra.mxu0 %v2730_v46  ;;  %1533 = vmatmul.bf16.vlgmr.msrb.gmra.mxu1 %v2732_v2 }
 0x103   :  { %1546 = vmatpush.bf16.msrb.mxu2 %v2127_v13  ;;  %1560 = vmatpush.bf16.msrb.mxu3 %v2191_v14 }
 0x106   :  { %1547 = vmatmul.bf16.vlgmr.msrb.gmra.mxu2 %v2736_v8  ;;  %1561 = vmatmul.bf16.vlgmr.msrb.gmra.mxu3 %v2738_v9 }
 0x13c   :  { %v1352_v18 = vpop.f32.mrf.mxu0  ;;  %v1366_v25 = vpop.f32.mrf.mxu1 }
 0x13d   :  { %v1353_v30 = vadd.f32 %v1352_v18, %v699_v27 }
 0x13f   :  { %v1367_v46 = vadd.f32 %v1366_v25, %v1353_v30 }
 0x144   :  { %v1354_v28 = vpop.f32.mrf.mxu0  ;;  %v1368_v29 = vpop.f32.mrf.mxu1 }
 0x145   :  { %v1355_v33 = vadd.f32 %v1354_v28, %v699_v27 }
 0x147   :  { %v1369_v9 = vadd.f32 %v1368_v29, %v1355_v33 }
 0x149   :  { %v1380_v32 = vpop.f32.mrf.mxu2  ;;  %v1394_v23 = vpop.f32.mrf.mxu3 }
 0x14a   :  { %v1381_v2 = vadd.f32 %v1380_v32, %v1367_v46 }
 0x14c   :  { %v1395_v40 = vadd.f32 %v1394_v23, %v1381_v2 }
 0x14d   :  { %v1408_v34 = vpop.f32.mrf.mxu0  ;;  %v1422_v45 = vpop.f32.mrf.mxu1 }
 0x14e   :  { %v1409_v43 = vadd.f32 %v1408_v34, %v1395_v40 }
 0x150   :  { %v1423_v47 = vadd.f32 %v1422_v45, %v1409_v43 }
 0x151   :  { %v1382_v8 = vpop.f32.mrf.mxu2  ;;  %v1396_v41 = vpop.f32.mrf.mxu3 }
 0x152   :  { %v1383_v44 = vadd.f32 %v1382_v8, %v1369_v9 }
 0x154   :  { %v1397_v48 = vadd.f32 %v1396_v41, %v1383_v44 }
 0x155   :  { %v1410_v61 = vpop.f32.mrf.mxu0  ;;  %v1424_v42 = vpop.f32.mrf.mxu1 }
 0x156   :  { %v1411_v38 = vadd.f32 %v1410_v61, %v1397_v48 }
 0x158   :  { %v1425_v1 = vadd.f32 %v1424_v42, %v1411_v38 }
 0x159   :  { %v1436_v39 = vpop.f32.mrf.mxu2  ;;  %v1450_v50 = vpop.f32.mrf.mxu3 }
 0x15a   :  { %v1437_v49 = vadd.f32 %v1436_v39, %v1423_v47 }
 0x15c   :  { %v1451_v51 = vadd.f32 %v1450_v50, %v1437_v49 }
 0x15d   :  { %v1464_v54 = vpop.f32.mrf.mxu0  ;;  %v1478_v17 = vpop.f32.mrf.mxu1 }
 0x15e   :  { %2422 = vtanh.f32 %v1451_v51  ;;  %v1465_v58 = vadd.f32 %v1464_v54, %v700_v31 }
 0x160   :  { %v1479_v59 = vadd.f32 %v1478_v17, %v1465_v58 }
 0x161   :  { %v1438_v52 = vpop.f32.mrf.mxu2  ;;  %v1452_v11 = vpop.f32.mrf.mxu3 }
 0x162   :  { %v1439_v53 = vadd.f32 %v1438_v52, %v1425_v1 }
 0x164   :  { %v2423_v12 = vpop.eup %2422  ;;  %v1453_v26 = vadd.f32 %v1452_v11, %v1439_v53 }
 0x165   :  { %1571 = vst [vmem:[#allocation10] sm:$0xff] %v2423_v12  ;;  %v1466_v55 = vpop.f32.mrf.mxu0  ;;  %v1480_v60 = vpop.f32.mrf.mxu1 }
 0x166   :  { %2424 = vtanh.f32 %v1453_v26  ;;  %v1467_v36 = vadd.f32 %v1466_v55, %v700_v31 }
 0x168   :  { %v1481_v3 = vadd.f32 %v1480_v60, %v1467_v36 }
 0x169   :  { %v1492_v56 = vpop.f32.mrf.mxu2  ;;  %v1506_v57 = vpop.f32.mrf.mxu3 }
 0x16a   :  { %v1493_v35 = vadd.f32 %v1492_v56, %v1479_v59 }
 0x16c   :  { %v2425_v16 = vpop.eup %2424  ;;  %v1507_v0 = vadd.f32 %v1506_v57, %v1493_v35 }
 0x16d   :  { %1573 = vst [vmem:[#allocation10 + $0x10] sm:$0xff] %v2425_v16 }
 0x171   :  { %v1494_v62 = vpop.f32.mrf.mxu2  ;;  %v1508_v63 = vpop.f32.mrf.mxu3 }
 0x172   :  { %v1495_v22 = vadd.f32 %v1494_v62, %v1481_v3 }
 0x174   :  { %v1509_v10 = vadd.f32 %v1508_v63, %v1495_v22 }
 0x17d   :  { %v1520_v15 = vpop.f32.mrf.mxu0  ;;  %v1534_v21 = vpop.f32.mrf.mxu1 }
 0x17e   :  { %v1521_v4 = vadd.f32 %v1520_v15, %v1507_v0 }
 0x180   :  { %v1535_v37 = vadd.f32 %v1534_v21, %v1521_v4 }
 0x185   :  { %v1522_v5 = vpop.f32.mrf.mxu0  ;;  %v1536_v14 = vpop.f32.mrf.mxu1 }
 0x186   :  { %v1523_v20 = vadd.f32 %v1522_v5, %v1509_v10 }
 0x188   :  { %v1537_v18 = vadd.f32 %v1536_v14, %v1523_v20 }
 0x189   :  { %v1548_v6 = vpop.f32.mrf.mxu2  ;;  %v1562_v7 = vpop.f32.mrf.mxu3 }
 0x18a   :  { %v1549_v19 = vadd.f32 %v1548_v6, %v1535_v37 }
 0x18c   :  { %v1563_v13 = vadd.f32 %v1562_v7, %v1549_v19 }
 0x18e   :  { %2426 = vtanh.f32 %v1563_v13 }
 0x191   :  { %v1550_v24 = vpop.f32.mrf.mxu2  ;;  %v1564_v27 = vpop.f32.mrf.mxu3 }
 0x192   :  { %v1551_v25 = vadd.f32 %v1550_v24, %v1537_v18 }
 0x194   :  { %v2427_v28 = vpop.eup %2426  ;;  %v1565_v30 = vadd.f32 %v1564_v27, %v1551_v25 }
 0x195   :  { %1572 = vst [vmem:[#allocation10 + $0x8] sm:$0xff] %v2427_v28 }
 0x196   :  { %2428 = vtanh.f32 %v1565_v30 }
 0x19c   :  { %v2429_v32 = vpop.eup %2428 }
 0x19d   :  { %1574 = vst [vmem:[#allocation10 + $0x18] sm:$0xff] %v2429_v32 }
 0x19e   :  { %1587 = dma.vmem_to_hbm [thread:$0]  %s1580_s17, 512, %s1582_s20, [#allocation4], %s2569_s21, %s2569_s21, %s2570_s22  }
 0x19f   :  { %2556 = dma.done.wait [#allocation4], 512  }
 0x1a0   :  { %2557 = vsyncadd [#allocation4], 4294966784 }
 0x1a1   :  { %1592 = vsyncpa [#allocation3], 1 }
 0x1a2   :  { %1593 = vsyncpa [#allocation6], 1 }
 0x1a3   :  { %1594 = vsyncpa [#allocation9], 1 }
 0x1a4   :  { %1595 = vsyncpa [#allocation4], 1 }

</bundles_post_ra>
